<compile_context>
chip_gen: v7x
topology: tpu7x:2x2x1
jax: 0.10.0
libtpu: 0.0.40
codegen_flags: <defaults>
</compile_context>

<pallas_src>
import math

import jax
import jax.numpy as jnp
import numpy as np
from jax.experimental import pallas as pl
from jax.experimental.pallas import tpu as pltpu

LANE = 128


def _round_up(x, m):
    return ((x + m - 1) // m) * m


# ---------------------------------------------------------------------------
# Fused per-batch kernel
# ---------------------------------------------------------------------------
def _stgcn_fused_kernel(xs_ref, a_ref, w1_ref, th_ref, w2_ref, o_ref):
    """Fused temporal1 -> graph conv -> temporal2 for ONE batch element.

    xs_ref : (N*T1, KCp)   im2col slab of X for this batch (KCp = pad128(K*Cin))
    a_ref  : (N, N)        normalized adjacency (resident)
    w1_ref : (KCp, 2*Cp)   temporal1 weights, cols = [w1+w2 | w3], Cp = pad128(Cout)
    th_ref : (Cp, Sp)      Theta1 zero-padded to (Cp, Sp), Sp = pad128(S)
    w2_ref : (K*Sp, 2*Cp)  temporal2 weights, tap k occupies rows [k*Sp, k*Sp+S)
    o_ref  : (N*T2, Cp)    gated-conv output for this batch (padded channels = 0)
    """
    n = a_ref.shape[0]
    cp = w1_ref.shape[1] // 2
    sp = th_ref.shape[1]
    k = w2_ref.shape[0] // sp
    t1 = xs_ref.shape[0] // n
    t2 = t1 - k + 1

    # --- temporal1: single im2col matmul; [temp | gate] slices are 128-aligned
    acc1 = jnp.dot(xs_ref[...], w1_ref[...], preferred_element_type=jnp.float32)
    act1 = jnp.maximum(jax.nn.sigmoid(acc1[:, cp:]) * acc1[:, :cp], 0.0)  # (N*T1, Cp)

    # --- graph conv: channel mix (Theta1) first, node aggregation second, ReLU
    z = jnp.dot(act1, th_ref[...], preferred_element_type=jnp.float32)    # (N*T1, Sp)
    z = z.reshape(n, t1 * sp)                                             # row-major fold
    lfs = jnp.dot(a_ref[...], z, preferred_element_type=jnp.float32)      # (N, T1*Sp)
    g = jnp.maximum(lfs, 0.0)

    # --- temporal2: unfold as K lane-tile-aligned slices of the (N, T1*Sp) slab
    w2 = w2_ref[...]
    acc2 = None
    for kk in range(k):
        piece = g[:, kk * sp:(kk + t2) * sp].reshape(n * t2, sp)          # (N*T2, Sp)
        contrib = jnp.dot(piece, w2[kk * sp:(kk + 1) * sp, :],
                          preferred_element_type=jnp.float32)             # (N*T2, 2*Cp)
        acc2 = contrib if acc2 is None else acc2 + contrib

    out = jnp.maximum(jax.nn.sigmoid(acc2[:, cp:]) * acc2[:, :cp], 0.0)
    o_ref[...] = out.astype(o_ref.dtype)


# ---------------------------------------------------------------------------
# Wrapper
# ---------------------------------------------------------------------------
def stgcn_block_forward(x, a_hat, w1p, thp, w2p, *, cout):
    """Full STGCNBlock_NonBias forward.

    x      : (B, N, T, C_in)
    a_hat  : (N, N) normalized adjacency
    w1p, thp, w2p : packed/padded weights from pack_params()
    returns: (B, N, T - 2*(K-1), cout)
    """
    b, n, t, cin = x.shape
    kcp, two_cp = w1p.shape
    cp = two_cp // 2
    sp = thp.shape[1]
    k = w2p.shape[0] // sp
    t1 = t - k + 1
    t2 = t1 - k + 1
    kcin = k * cin

    # lane-dense im2col slab for temporal1 (built once in XLA, outside the kernel)
    xs = jnp.concatenate([x[:, :, kk:kk + t1, :] for kk in range(k)], axis=-1)
    xs = xs.reshape(b, n * t1, kcin)
    if kcp > kcin:
        xs = jnp.pad(xs, ((0, 0), (0, 0), (0, kcp - kcin)))

    # TODO(synk): at realistic sizes cast xs / a_hat / w1p / thp / w2p to bf16 here
    # (keep preferred_element_type=f32 in-kernel) to fill the 256-wide MXU on v6e/v7x.

    flops = (2 * b * (n * t1) * kcp * two_cp          # temporal1
             + 2 * b * (n * t1) * cp * sp             # Theta1
             + 2 * b * n * n * (t1 * sp)              # adjacency aggregation
             + 2 * b * (n * t2) * (k * sp) * two_cp)  # temporal2
    transcendentals = b * n * (t1 + t2) * cp
    bytes_accessed = 4 * (b * (n * t1) * kcp + a_hat.size + w1p.size
                          + thp.size + w2p.size + b * (n * t2) * cp)

    out = pl.pallas_call(
        _stgcn_fused_kernel,
        out_shape=jax.ShapeDtypeStruct((b, n * t2, cp), x.dtype),
        grid=(b,),
        in_specs=[
            pl.BlockSpec((None, n * t1, kcp), lambda i: (i, 0, 0)),   # per-batch x tile
            pl.BlockSpec((n, n), lambda i: (0, 0)),                   # resident A_hat
            pl.BlockSpec((kcp, two_cp), lambda i: (0, 0)),            # resident weights
            pl.BlockSpec((cp, sp), lambda i: (0, 0)),
            pl.BlockSpec((k * sp, two_cp), lambda i: (0, 0)),
        ],
        out_specs=pl.BlockSpec((None, n * t2, cp), lambda i: (i, 0, 0)),
        compiler_params=pltpu.CompilerParams(
            dimension_semantics=("parallel",),
            vmem_limit_bytes=32 * 1024 * 1024),
        cost_estimate=pl.CostEstimate(flops=flops,
                                      transcendentals=transcendentals,
                                      bytes_accessed=bytes_accessed),
    )(xs, a_hat, w1p, thp, w2p)

    # un-pad channels and restore (B, N, T_out, C_out)
    return out[:, :, :cout].reshape(b, n, t2, cout)


# ---------------------------------------------------------------------------
# Parameter init (mirrors nn.Conv2d / reset_parameters) and packing
# ---------------------------------------------------------------------------
def _conv_weight(key, c_out, c_in, k):
    # nn.Conv2d default (kaiming_uniform, a=sqrt(5)) => bound = 1/sqrt(fan_in)
    bound = 1.0 / math.sqrt(c_in * 1 * k)
    w = jax.random.uniform(key, (c_out, c_in, 1, k), jnp.float32, -bound, bound)
    # (C_out, C_in, 1, K) -> (K, C_in, C_out)
    return jnp.transpose(w[:, :, 0, :], (2, 1, 0))


def init_params(key, in_channels, spatial_channels, out_channels, k=4):
    keys = jax.random.split(key, 7)
    temporal1 = tuple(_conv_weight(keys[i], out_channels, in_channels, k)
                      for i in range(3))
    stdv = 1.0 / math.sqrt(spatial_channels)
    theta1 = jax.random.uniform(keys[3], (out_channels, spatial_channels),
                                jnp.float32, -stdv, stdv)
    temporal2 = tuple(_conv_weight(keys[4 + i], out_channels, spatial_channels, k)
                      for i in range(3))
    return {"temporal1": temporal1, "theta1": theta1, "temporal2": temporal2}


def pack_params(params, lane=LANE):
    """Fold w1+w2, pad every matmul column/contraction block to 128 lanes."""
    w1s = params["temporal1"]          # 3 x (K, Cin, Cout)
    w2s = params["temporal2"]          # 3 x (K, S,   Cout)
    theta = params["theta1"]           # (Cout, S)
    k, cin, cout = w1s[0].shape
    _, s, _ = w2s[0].shape
    cp = _round_up(cout, lane)
    sp = _round_up(s, lane)
    kcp = _round_up(k * cin, lane)

    # temporal1: rows are (tap, cin) in k-major order; cols = [w1+w2 | w3]
    w1p = np.zeros((kcp, 2 * cp), np.float32)
    w1p[:k * cin, :cout] = np.asarray((w1s[0] + w1s[1]).reshape(k * cin, cout))
    w1p[:k * cin, cp:cp + cout] = np.asarray(w1s[2].reshape(k * cin, cout))

    # Theta1, zero-padded to (Cp, Sp)
    thp = np.zeros((cp, sp), np.float32)
    thp[:cout, :s] = np.asarray(theta)

    # temporal2: tap k occupies rows [k*Sp, k*Sp + S); cols = [w1+w2 | w3]
    w2p = np.zeros((k * sp, 2 * cp), np.float32)
    temp2 = np.asarray(w2s[0] + w2s[1])
    gate2 = np.asarray(w2s[2])
    for kk in range(k):
        w2p[kk * sp:kk * sp + s, :cout] = temp2[kk]
        w2p[kk * sp:kk * sp + s, cp:cp + cout] = gate2[kk]

    return jnp.asarray(w1p), jnp.asarray(thp), jnp.asarray(w2p)


# ---------------------------------------------------------------------------
# Pure-JAX reference (for correctness check)
# ---------------------------------------------------------------------------
def _time_block_ref(x, w1, w2, w3):
    k = w1.shape[0]
    t_out = x.shape[2] - k + 1

    def conv(w):
        return sum(jnp.einsum("bntc,co->bnto", x[:, :, i:i + t_out, :], w[i])
                   for i in range(k))

    temp = conv(w1) + conv(w2)
    gate = jax.nn.sigmoid(conv(w3))
    return jnp.maximum(gate * temp, 0.0)


def _stgcn_ref(x, a_hat, params):
    t = _time_block_ref(x, *params["temporal1"])
    lfs = jnp.einsum("ij,bjtc->bitc", a_hat, t)
    t2 = jnp.maximum(jnp.einsum("bitc,cs->bits", lfs, params["theta1"]), 0.0)
    return _time_block_ref(t2, *params["temporal2"])


# ---------------------------------------------------------------------------
if __name__ == "__main__":
    B, N, T = 2, 8, 12          # batch, num_nodes, num_timesteps
    C_IN, S, C_OUT = 4, 16, 8   # in_channels, spatial_channels, out_channels
    K = 4

    key = jax.random.PRNGKey(0)
    k_x, k_a, k_p = jax.random.split(key, 3)

    x = jax.random.normal(k_x, (B, N, T, C_IN), jnp.float32)
    # symmetric-ish row-normalized "adjacency"
    a_raw = jnp.abs(jax.random.normal(k_a, (N, N), jnp.float32)) + jnp.eye(N)
    a_hat = a_raw / jnp.sum(a_raw, axis=1, keepdims=True)

    params = init_params(k_p, C_IN, S, C_OUT, k=K)
    w1p, thp, w2p = pack_params(params)

    fwd = jax.jit(stgcn_block_forward, static_argnames=("cout",))
    out = jax.block_until_ready(fwd(x, a_hat, w1p, thp, w2p, cout=C_OUT))

    ref = _stgcn_ref(x, a_hat, params)
    assert out.shape == (B, N, T - 2 * (K - 1), C_OUT), out.shape
    np.testing.assert_allclose(np.asarray(out), np.asarray(ref),
                               rtol=1e-5, atol=1e-5)
    print("KERNEL_OK")
</pallas_src>

<mosaic_0001>
module attributes {stable_mosaic.version = 11 : i64} {
  func.func @_stgcn_fused_kernel(%arg0: i32, %arg1: memref<1x72x128xf32, #tpu.memory_space<vmem>>, %arg2: memref<8x8xf32, #tpu.memory_space<vmem>>, %arg3: memref<128x256xf32, #tpu.memory_space<vmem>>, %arg4: memref<128x128xf32, #tpu.memory_space<vmem>>, %arg5: memref<512x256xf32, #tpu.memory_space<vmem>>, %arg6: memref<1x48x128xf32, #tpu.memory_space<vmem>>) attributes {dimension_semantics = [#tpu.dimension_semantics<parallel>], iteration_bounds = array<i64: 2>, scalar_prefetch = 0 : i64, scratch_operands = 0 : i64, tpu.core_type = #tpu.core_type<tc>, window_params = [{transform_indices = @transform_0, window_bounds = array<i64: 1, 72, 128>}, {pipeline_mode = #tpu.pipeline_mode<synchronous>, transform_indices = @transform_1, window_bounds = array<i64: 8, 8>}, {pipeline_mode = #tpu.pipeline_mode<synchronous>, transform_indices = @transform_2, window_bounds = array<i64: 128, 256>}, {pipeline_mode = #tpu.pipeline_mode<synchronous>, transform_indices = @transform_3, window_bounds = array<i64: 128, 128>}, {pipeline_mode = #tpu.pipeline_mode<synchronous>, transform_indices = @transform_4, window_bounds = array<i64: 512, 256>}, {transform_indices = @transform_5, window_bounds = array<i64: 1, 48, 128>}]} {
    %c0 = arith.constant 0 : index
    %c0_0 = arith.constant 0 : index
    %c0_1 = arith.constant 0 : index
    %0 = vector.load %arg1[%c0, %c0_0, %c0_1] : memref<1x72x128xf32, #tpu.memory_space<vmem>>, vector<1x72x128xf32>
    %1 = vector.shape_cast %0 : vector<1x72x128xf32> to vector<72x128xf32>
    %c0_2 = arith.constant 0 : index
    %c0_3 = arith.constant 0 : index
    %2 = vector.load %arg3[%c0_2, %c0_3] : memref<128x256xf32, #tpu.memory_space<vmem>>, vector<128x256xf32>
    %cst = arith.constant dense<0.000000e+00> : vector<72x256xf32>
    %3 = tpu.matmul %1, %2, %cst {dimension_numbers = #tpu.dot_dimension_numbers<[1], [0], [0], [1], [0, 0, 1, 1], [], []>} : vector<72x128xf32>, vector<128x256xf32>, vector<72x256xf32> -> vector<72x256xf32>
    %4 = vector.extract_strided_slice %3 {offsets = [0, 128], sizes = [72, 128], strides = [1, 1]} : vector<72x256xf32> to vector<72x128xf32>
    %5 = arith.negf %4 : vector<72x128xf32>
    %6 = math.exp %5 : vector<72x128xf32>
    %cst_4 = arith.constant 1.000000e+00 : f32
    %7 = vector.broadcast %cst_4 : f32 to vector<72x128xf32>
    %8 = arith.addf %7, %6 : vector<72x128xf32>
    %9 = arith.divf %7, %8 : vector<72x128xf32>
    %10 = vector.extract_strided_slice %3 {offsets = [0, 0], sizes = [72, 128], strides = [1, 1]} : vector<72x256xf32> to vector<72x128xf32>
    %11 = arith.mulf %9, %10 : vector<72x128xf32>
    %cst_5 = arith.constant 0.000000e+00 : f32
    %12 = vector.broadcast %cst_5 : f32 to vector<72x128xf32>
    %13 = arith.maximumf %11, %12 : vector<72x128xf32>
    %c0_6 = arith.constant 0 : index
    %c0_7 = arith.constant 0 : index
    %14 = vector.load %arg4[%c0_6, %c0_7] : memref<128x128xf32, #tpu.memory_space<vmem>>, vector<128x128xf32>
    %cst_8 = arith.constant dense<0.000000e+00> : vector<72x128xf32>
    %15 = tpu.matmul %13, %14, %cst_8 {dimension_numbers = #tpu.dot_dimension_numbers<[1], [0], [0], [1], [0, 0, 1, 1], [], []>} : vector<72x128xf32>, vector<128x128xf32>, vector<72x128xf32> -> vector<72x128xf32>
    %16 = vector.shape_cast %15 : vector<72x128xf32> to vector<8x1152xf32>
    %c0_9 = arith.constant 0 : index
    %c0_10 = arith.constant 0 : index
    %17 = vector.load %arg2[%c0_9, %c0_10] : memref<8x8xf32, #tpu.memory_space<vmem>>, vector<8x8xf32>
    %cst_11 = arith.constant dense<0.000000e+00> : vector<8x1152xf32>
    %18 = tpu.matmul %17, %16, %cst_11 {dimension_numbers = #tpu.dot_dimension_numbers<[1], [0], [0], [1], [0, 0, 1, 1], [], []>} : vector<8x8xf32>, vector<8x1152xf32>, vector<8x1152xf32> -> vector<8x1152xf32>
    %cst_12 = arith.constant 0.000000e+00 : f32
    %19 = vector.broadcast %cst_12 : f32 to vector<8x1152xf32>
    %20 = arith.maximumf %18, %19 : vector<8x1152xf32>
    %c0_13 = arith.constant 0 : index
    %c0_14 = arith.constant 0 : index
    %21 = vector.load %arg5[%c0_13, %c0_14] : memref<512x256xf32, #tpu.memory_space<vmem>>, vector<512x256xf32>
    %22 = vector.extract_strided_slice %20 {offsets = [0, 0], sizes = [8, 768], strides = [1, 1]} : vector<8x1152xf32> to vector<8x768xf32>
    %23 = vector.shape_cast %22 : vector<8x768xf32> to vector<48x128xf32>
    %24 = vector.extract_strided_slice %21 {offsets = [0, 0], sizes = [128, 256], strides = [1, 1]} : vector<512x256xf32> to vector<128x256xf32>
    %cst_15 = arith.constant dense<0.000000e+00> : vector<48x256xf32>
    %25 = tpu.matmul %23, %24, %cst_15 {dimension_numbers = #tpu.dot_dimension_numbers<[1], [0], [0], [1], [0, 0, 1, 1], [], []>} : vector<48x128xf32>, vector<128x256xf32>, vector<48x256xf32> -> vector<48x256xf32>
    %26 = vector.extract_strided_slice %20 {offsets = [0, 128], sizes = [8, 768], strides = [1, 1]} : vector<8x1152xf32> to vector<8x768xf32>
    %27 = vector.shape_cast %26 : vector<8x768xf32> to vector<48x128xf32>
    %28 = vector.extract_strided_slice %21 {offsets = [128, 0], sizes = [128, 256], strides = [1, 1]} : vector<512x256xf32> to vector<128x256xf32>
    %cst_16 = arith.constant dense<0.000000e+00> : vector<48x256xf32>
    %29 = tpu.matmul %27, %28, %cst_16 {dimension_numbers = #tpu.dot_dimension_numbers<[1], [0], [0], [1], [0, 0, 1, 1], [], []>} : vector<48x128xf32>, vector<128x256xf32>, vector<48x256xf32> -> vector<48x256xf32>
    %30 = arith.addf %25, %29 : vector<48x256xf32>
    %31 = vector.extract_strided_slice %20 {offsets = [0, 256], sizes = [8, 768], strides = [1, 1]} : vector<8x1152xf32> to vector<8x768xf32>
    %32 = vector.shape_cast %31 : vector<8x768xf32> to vector<48x128xf32>
    %33 = vector.extract_strided_slice %21 {offsets = [256, 0], sizes = [128, 256], strides = [1, 1]} : vector<512x256xf32> to vector<128x256xf32>
    %cst_17 = arith.constant dense<0.000000e+00> : vector<48x256xf32>
    %34 = tpu.matmul %32, %33, %cst_17 {dimension_numbers = #tpu.dot_dimension_numbers<[1], [0], [0], [1], [0, 0, 1, 1], [], []>} : vector<48x128xf32>, vector<128x256xf32>, vector<48x256xf32> -> vector<48x256xf32>
    %35 = arith.addf %30, %34 : vector<48x256xf32>
    %36 = vector.extract_strided_slice %20 {offsets = [0, 384], sizes = [8, 768], strides = [1, 1]} : vector<8x1152xf32> to vector<8x768xf32>
    %37 = vector.shape_cast %36 : vector<8x768xf32> to vector<48x128xf32>
    %38 = vector.extract_strided_slice %21 {offsets = [384, 0], sizes = [128, 256], strides = [1, 1]} : vector<512x256xf32> to vector<128x256xf32>
    %cst_18 = arith.constant dense<0.000000e+00> : vector<48x256xf32>
    %39 = tpu.matmul %37, %38, %cst_18 {dimension_numbers = #tpu.dot_dimension_numbers<[1], [0], [0], [1], [0, 0, 1, 1], [], []>} : vector<48x128xf32>, vector<128x256xf32>, vector<48x256xf32> -> vector<48x256xf32>
    %40 = arith.addf %35, %39 : vector<48x256xf32>
    %41 = vector.extract_strided_slice %40 {offsets = [0, 128], sizes = [48, 128], strides = [1, 1]} : vector<48x256xf32> to vector<48x128xf32>
    %42 = arith.negf %41 : vector<48x128xf32>
    %43 = math.exp %42 : vector<48x128xf32>
    %cst_19 = arith.constant 1.000000e+00 : f32
    %44 = vector.broadcast %cst_19 : f32 to vector<48x128xf32>
    %45 = arith.addf %44, %43 : vector<48x128xf32>
    %46 = arith.divf %44, %45 : vector<48x128xf32>
    %47 = vector.extract_strided_slice %40 {offsets = [0, 0], sizes = [48, 128], strides = [1, 1]} : vector<48x256xf32> to vector<48x128xf32>
    %48 = arith.mulf %46, %47 : vector<48x128xf32>
    %cst_20 = arith.constant 0.000000e+00 : f32
    %49 = vector.broadcast %cst_20 : f32 to vector<48x128xf32>
    %50 = arith.maximumf %48, %49 : vector<48x128xf32>
    %c0_21 = arith.constant 0 : index
    %c0_22 = arith.constant 0 : index
    %c0_23 = arith.constant 0 : index
    %51 = vector.load %arg6[%c0_21, %c0_22, %c0_23] : memref<1x48x128xf32, #tpu.memory_space<vmem>>, vector<1x48x128xf32>
    %52 = vector.shape_cast %51 : vector<1x48x128xf32> to vector<48x128xf32>
    %53 = vector.shape_cast %50 : vector<48x128xf32> to vector<1x48x128xf32>
    tpu.vector_store %arg6[%c0_21, %c0_22, %c0_23], %53 {strides = array<i32>} : memref<1x48x128xf32, #tpu.memory_space<vmem>>, vector<1x48x128xf32>,
    return
  }
  func.func @transform_0(%arg0: i32) -> (i32, i32, i32) {
    %c0_i32 = arith.constant 0 : i32
    %c0_i32_0 = arith.constant 0 : i32
    %c0_i32_1 = arith.constant 0 : i32
    return %arg0, %c0_i32, %c0_i32_0 : i32, i32, i32
  }
  func.func @transform_1(%arg0: i32) -> (i32, i32) {
    %c0_i32 = arith.constant 0 : i32
    %c0_i32_0 = arith.constant 0 : i32
    %c0_i32_1 = arith.constant 0 : i32
    return %c0_i32, %c0_i32_0 : i32, i32
  }
  func.func @transform_2(%arg0: i32) -> (i32, i32) {
    %c0_i32 = arith.constant 0 : i32
    %c0_i32_0 = arith.constant 0 : i32
    %c0_i32_1 = arith.constant 0 : i32
    return %c0_i32, %c0_i32_0 : i32, i32
  }
  func.func @transform_3(%arg0: i32) -> (i32, i32) {
    %c0_i32 = arith.constant 0 : i32
    %c0_i32_0 = arith.constant 0 : i32
    %c0_i32_1 = arith.constant 0 : i32
    return %c0_i32, %c0_i32_0 : i32, i32
  }
  func.func @transform_4(%arg0: i32) -> (i32, i32) {
    %c0_i32 = arith.constant 0 : i32
    %c0_i32_0 = arith.constant 0 : i32
    %c0_i32_1 = arith.constant 0 : i32
    return %c0_i32, %c0_i32_0 : i32, i32
  }
  func.func @transform_5(%arg0: i32) -> (i32, i32, i32) {
    %c0_i32 = arith.constant 0 : i32
    %c0_i32_0 = arith.constant 0 : i32
    %c0_i32_1 = arith.constant 0 : i32
    return %arg0, %c0_i32, %c0_i32_0 : i32, i32, i32
  }
}

</mosaic_0001>

<bundles_post_ra>
// kernel: stgcn_block_forward.1
= control target key start
LH: loop header
LB: loop body
LE: loop exit
PB: predicated region body
PF: predicated region fallthrough
CT: control target
= control target key end

     0   :  { %s2461_s18 = smov 0   ;;  %s3969_s0 = inlined_call_operand.vmem [shape: f32[2,72,128], index: 0, kind: input, shape index: {}]   ;;  %s3970_s1 = inlined_call_operand.vmem [shape: f32[8,8], index: 1, kind: input, shape index: {}]   ;;  %s3971_s2 = inlined_call_operand.vmem [shape: f32[128,256], index: 2, kind: input, shape index: {}]   ;;  %s3972_s3 = inlined_call_operand.vmem [shape: f32[128,128], index: 3, kind: input, shape index: {}]   ;;  %s3973_s4 = inlined_call_operand.vmem [shape: f32[512,256], index: 4, kind: input, shape index: {}]   ;;  %s3974_s5 = inlined_call_operand.vmem [shape: f32[2,48,128], index: 5, kind: output, shape index: {}]  }
   0x1 LB: > { %s2007_s19 = sadd.s32 4294967295, %s2426_s18   ;;  %p2011_p0 = scmp.ge.s32.totalorder %s2426_s18, 1  ;;  %s2426_s18 = sphi %s2461_s18, %s15_s18  }
   0x2   : > { %p187_p1 = scmp.lt.s32.totalorder %s2426_s18, 3 }
   0x4   : > { %p188_p2 = pnand %p2011_p0, %p187_p1 }
   0x6   : > { %191 = sbr.rel (%p188_p2) target bundleno = 1141 (0x475), region = 40 }
   0xd   : > { %v235_v0 = vld [vmem:[%s3971_s2 + $0x8] sm:$0xff]  ;;  %v237_v1 = vld [vmem:[%s3971_s2 + $0x18] sm:$0xff]  ;;  %v234_v2 = vld [vmem:[%s3971_s2] sm:$0xff]  ;;  %v3975_v7 = vmov 0.0   ;;  %p215_p3 = scmp.lt.s32.totalorder %s2007_s19, 1  ;;  %v2429_v61 = vmov 0.0|0.0  }
   0xe   : > { %v2127_v3 = vpack.c.bf16 %v237_v1, %v235_v0  ;;  %v236_v4 = vld [vmem:[%s3971_s2 + $0x10] sm:$0xff]  ;;  %v239_v5 = vld [vmem:[%s3971_s2 + $0x28] sm:$0xff]  ;;  %v241_v6 = vld [vmem:[%s3971_s2 + $0x38] sm:$0xff]  ;;  %330 = vmatprep.mubr.f32.mxu0 %v3975_v7  ;;  %1424 = vmatprep.mubr.f32.mxu1 %v3975_v7  ;;  %vm2430_vm0 = vmmov 0   ;;  %vm583_vm1 = vcmask 1040384   ;;  %vm585_vm2 = vcmask 1041409  }
   0xf   : > { %v2129_v8 = vpack.c.bf16 %v236_v4, %v234_v2  ;;  %v2131_v9 = vpack.c.bf16 %v241_v6, %v239_v5  ;;  %v238_v10 = vld [vmem:[%s3971_s2 + $0x20] sm:$0xff]  ;;  %v240_v11 = vld [vmem:[%s3971_s2 + $0x30] sm:$0xff]  ;;  %v243_v12 = vld [vmem:[%s3971_s2 + $0x48] sm:$0xff]  ;;  %s4125_s19 = smov (!%p215_p3, %s2007_s19), 1  ;;  %vm587_vm3 = vcmask 1042434   ;;  %vm589_vm4 = vcmask 1043459  }
  0x10   : > { %2128 = vmatprep.subr.bf16.mxu0 %v2127_v3  ;;  %v245_v13 = vld [vmem:[%s3971_s2 + $0x58] sm:$0xff]  ;;  %v2133_v14 = vpack.c.bf16 %v240_v11, %v238_v10  ;;  %v242_v16 = vld [vmem:[%s3971_s2 + $0x40] sm:$0xff]  ;;  %v244_v17 = vld [vmem:[%s3971_s2 + $0x50] sm:$0xff]  ;;  %s2347_s13 = smul.u32 72, %s4125_s19  ;;  %vm591_vm5 = vcmask 1044484   ;;  %vm593_vm6 = vcmask 1045509  }
  0x11   : > { %2130 = vmatpush1.bf16.msra.mxu0 %v2129_v8  ;;  %v2135_v15 = vpack.c.bf16 %v245_v13, %v243_v12  ;;  %v247_v18 = vld [vmem:[%s3971_s2 + $0x68] sm:$0xff]  ;;  %v249_v19 = vld [vmem:[%s3971_s2 + $0x78] sm:$0xff]  ;;  %v2137_v20 = vpack.c.bf16 %v244_v17, %v242_v16  ;;  %v246_v22 = vld [vmem:[%s3971_s2 + $0x60] sm:$0xff]  ;;  %vm595_vm7 = vcmask 1046534   ;;  %vm597_vm8 = vcmask 1047559   ;;  %s2348_s8 = smul.u32 48, %s4125_s19 }
  0x12   : > { %2132 = vmatprep.subr.bf16.mxu0 %v2131_v9  ;;  %v2139_v21 = vpack.c.bf16 %v249_v19, %v247_v18  ;;  %v248_v23 = vld [vmem:[%s3971_s2 + $0x70] sm:$0xff]  ;;  %v251_v24 = vld [vmem:[%s3971_s2 + $0x88] sm:$0xff]  ;;  %v253_v25 = vld [vmem:[%s3971_s2 + $0x98] sm:$0xff]  ;;  %s219_s16 = scalar_lea.vmem %s3969_s0, %s2347_s13  ;;  %vm720_vm9 = vcmask 64512  }
  0x13   : > { %v2141_v26 = vpack.c.bf16 %v248_v23, %v246_v22  ;;  %v2143_v27 = vpack.c.bf16 %v253_v25, %v251_v24  ;;  %v250_v28 = vld [vmem:[%s3971_s2 + $0x80] sm:$0xff]  ;;  %v252_v29 = vld [vmem:[%s3971_s2 + $0x90] sm:$0xff]  ;;  %v255_v30 = vld [vmem:[%s3971_s2 + $0xa8] sm:$0xff]  ;;  %s224_s11 = scalar_lea.vmem %s3974_s5, %s2348_s8 }
  0x14   : > { %v257_v31 = vld [vmem:[%s3971_s2 + $0xb8] sm:$0xff]  ;;  %v2145_v32 = vpack.c.bf16 %v252_v29, %v250_v28  ;;  %v254_v34 = vld [vmem:[%s3971_s2 + $0xa0] sm:$0xff]  ;;  %v256_v35 = vld [vmem:[%s3971_s2 + $0xb0] sm:$0xff] }
  0x15   : > { %2134 = vmatpush1.bf16.msra.mxu0 %v2133_v14  ;;  %v2147_v33 = vpack.c.bf16 %v257_v31, %v255_v30  ;;  %v259_v36 = vld [vmem:[%s3971_s2 + $0xc8] sm:$0xff]  ;;  %v261_v37 = vld [vmem:[%s3971_s2 + $0xd8] sm:$0xff]  ;;  %v2149_v38 = vpack.c.bf16 %v256_v35, %v254_v34  ;;  %v258_v40 = vld [vmem:[%s3971_s2 + $0xc0] sm:$0xff] }
  0x16   : > { %2136 = vmatprep.subr.bf16.mxu0 %v2135_v15  ;;  %v2151_v39 = vpack.c.bf16 %v261_v37, %v259_v36  ;;  %v260_v41 = vld [vmem:[%s3971_s2 + $0xd0] sm:$0xff]  ;;  %v263_v42 = vld [vmem:[%s3971_s2 + $0xe8] sm:$0xff]  ;;  %v265_v43 = vld [vmem:[%s3971_s2 + $0xf8] sm:$0xff] }
  0x17   : > { %v2153_v44 = vpack.c.bf16 %v260_v41, %v258_v40  ;;  %v2155_v45 = vpack.c.bf16 %v265_v43, %v263_v42  ;;  %v262_v46 = vld [vmem:[%s3971_s2 + $0xe0] sm:$0xff]  ;;  %v264_v47 = vld [vmem:[%s3971_s2 + $0xf0] sm:$0xff]  ;;  %v226_v50 = vld [vmem:[%s219_s16 + $0x8] sm:$0xff] }
  0x18   : > { %v2157_v48 = vpack.c.bf16 %v264_v47, %v262_v46  ;;  %v225_v49 = vld [vmem:[%s219_s16] sm:$0xff]  ;;  %v227_v51 = vld [vmem:[%s219_s16 + $0x10] sm:$0xff]  ;;  %v228_v52 = vld [vmem:[%s219_s16 + $0x18] sm:$0xff] }
  0x19   : > { %2138 = vmatpush1.bf16.msra.mxu0 %v2137_v20  ;;  %v229_v53 = vld [vmem:[%s219_s16 + $0x20] sm:$0xff]  ;;  %v230_v54 = vld [vmem:[%s219_s16 + $0x28] sm:$0xff]  ;;  %v231_v55 = vld [vmem:[%s219_s16 + $0x30] sm:$0xff] }
  0x1a   : > { %2140 = vmatprep.subr.bf16.mxu0 %v2139_v21  ;;  %v232_v56 = vld [vmem:[%s219_s16 + $0x38] sm:$0xff]  ;;  %v233_v57 = vld [vmem:[%s219_s16 + $0x40] sm:$0xff]  ;;  %v458_v59 = vld [vmem:[%s3972_s3 + $0x8] sm:$0xff] }
  0x1b   : > { %v457_v58 = vld [vmem:[%s3972_s3] sm:$0xff]  ;;  %v459_v62 = vld [vmem:[%s3972_s3 + $0x10] sm:$0xff]  ;;  %v460_v63 = vld [vmem:[%s3972_s3 + $0x18] sm:$0xff] }
  0x1c   : > { %v2160_v60 = vpack.c.bf16 %v458_v59, %v457_v58  ;;  %v2163_v0 = vpack.c.bf16 %v460_v63, %v459_v62  ;;  %v461_v1 = vld [vmem:[%s3972_s3 + $0x20] sm:$0xff]  ;;  %v462_v2 = vld [vmem:[%s3972_s3 + $0x28] sm:$0xff]  ;;  %v463_v4 = vld [vmem:[%s3972_s3 + $0x30] sm:$0xff] }
  0x1d   : > { %2142 = vmatpush1.bf16.msra.mxu0 %v2141_v26  ;;  %v2166_v3 = vpack.c.bf16 %v462_v2, %v461_v1  ;;  %v464_v5 = vld [vmem:[%s3972_s3 + $0x38] sm:$0xff]  ;;  %v465_v8 = vld [vmem:[%s3972_s3 + $0x40] sm:$0xff]  ;;  %v466_v9 = vld [vmem:[%s3972_s3 + $0x48] sm:$0xff] }
  0x1e   : > { %2144 = vmatprep.subr.bf16.mxu0 %v2143_v27  ;;  %v2169_v6 = vpack.c.bf16 %v464_v5, %v463_v4  ;;  %v2172_v10 = vpack.c.bf16 %v466_v9, %v465_v8  ;;  %v467_v11 = vld [vmem:[%s3972_s3 + $0x50] sm:$0xff]  ;;  %v468_v12 = vld [vmem:[%s3972_s3 + $0x58] sm:$0xff]  ;;  %v469_v14 = vld [vmem:[%s3972_s3 + $0x60] sm:$0xff] }
  0x1f   : > { %v2175_v13 = vpack.c.bf16 %v468_v12, %v467_v11  ;;  %v470_v15 = vld [vmem:[%s3972_s3 + $0x68] sm:$0xff]  ;;  %v471_v17 = vld [vmem:[%s3972_s3 + $0x70] sm:$0xff]  ;;  %v472_v18 = vld [vmem:[%s3972_s3 + $0x78] sm:$0xff] }
  0x20   : > { %v2178_v16 = vpack.c.bf16 %v470_v15, %v469_v14  ;;  %v2181_v19 = vpack.c.bf16 %v472_v18, %v471_v17 }
  0x21   : > { %2146 = vmatpush1.bf16.msra.mxu0 %v2145_v32 }
  0x22   : > { %2148 = vmatprep.subr.bf16.mxu0 %v2147_v33 }
  0x25   : > { %2150 = vmatpush1.bf16.msra.mxu0 %v2149_v38 }
  0x26   : > { %2152 = vmatprep.subr.bf16.mxu0 %v2151_v39 }
  0x29   : > { %2154 = vmatpush1.bf16.msra.mxu0 %v2153_v44 }
  0x2a   : > { %2156 = vmatprep.subr.bf16.mxu0 %v2155_v45 }
  0x2d   : > { %2158 = vmatpush1.bf16.msra.mxu0 %v2157_v48 }
  0x2e   : > { %2159 = vmatprep.subr.bf16.mxu0 %v2429_v61 }
  0x30   : > { %331 = vmatmul.mubr.f32.vlgmr.msra.gmra.mrb[0].mxu0 %v225_v49 }
  0x31   : > { %336 = vmatprep.mubr.f32.mxu0 %v3975_v7  ;;  %2161 = vmatpush3.bf16.msra.mxu0 %v2160_v60 }
  0x32   : > { %2162 = vmatprep.subr.bf16.mxu0 %v2429_v61 }
  0x34   : > { %337 = vmatmul.mubr.f32.gmra.mrb[2].mxu0 %v226_v50 }
  0x35   : > { %342 = vmatprep.mubr.f32.mxu0 %v3975_v7  ;;  %2164 = vmatpush3.bf16.msra.mxu0 %v2163_v0 }
  0x36   : > { %2165 = vmatprep.subr.bf16.mxu0 %v2429_v61 }
  0x38   : > { %343 = vmatmul.mubr.f32.gmra.mrb[4].mxu0 %v227_v51 }
  0x39   : > { %348 = vmatprep.mubr.f32.mxu0 %v3975_v7  ;;  %2167 = vmatpush3.bf16.msra.mxu0 %v2166_v3 }
  0x3a   : > { %2168 = vmatprep.subr.bf16.mxu0 %v2429_v61 }
  0x3c   : > { %349 = vmatmul.mubr.f32.gmra.mrb[6].mxu0 %v228_v52 }
  0x3d   : > { %354 = vmatprep.mubr.f32.mxu0 %v3975_v7  ;;  %2170 = vmatpush3.bf16.msra.mxu0 %v2169_v6 }
  0x3e   : > { %2171 = vmatprep.subr.bf16.mxu0 %v2429_v61 }
  0x40   : > { %355 = vmatmul.mubr.f32.gmra.mrb[8].mxu0 %v229_v53 }
  0x41   : > { %360 = vmatprep.mubr.f32.mxu0 %v3975_v7  ;;  %2173 = vmatpush3.bf16.msra.mxu0 %v2172_v10 }
  0x42   : > { %2174 = vmatprep.subr.bf16.mxu0 %v2429_v61 }
  0x44   : > { %361 = vmatmul.mubr.f32.gmra.mrb[10].mxu0 %v230_v54 }
  0x45   : > { %366 = vmatprep.mubr.f32.mxu0 %v3975_v7  ;;  %2176 = vmatpush3.bf16.msra.mxu0 %v2175_v13 }
  0x46   : > { %2177 = vmatprep.subr.bf16.mxu0 %v2429_v61 }
  0x48   : > { %367 = vmatmul.mubr.f32.gmra.mrb[12].mxu0 %v231_v55 }
  0x49   : > { %372 = vmatprep.mubr.f32.mxu0 %v3975_v7  ;;  %2179 = vmatpush3.bf16.msra.mxu0 %v2178_v16 }
  0x4a   : > { %2180 = vmatprep.subr.bf16.mxu0 %v2429_v61 }
  0x4c   : > { %373 = vmatmul.mubr.f32.gmra.mrb[14].mxu0 %v232_v56 }
  0x4d   : > { %378 = vmatprep.mubr.f32.mxu0 %v3975_v7  ;;  %2182 = vmatpush3.bf16.msra.mxu0 %v2181_v19 }
  0x50   : > { %379 = vmatmul.mubr.f32.gmra.mrb[16].mxu0 %v233_v57 }
  0x51   : > { %2095 = vmatprep.mubr.msk.f32.mxu0 %vm2430_vm0, %v3975_v7 }
 0x103   : > { %v332_v20 = vpop.f32.mrb[0].mxu0 }
 0x104   : > { %v334_v21 = vpop.f32.mrb[1].mxu0 }
 0x105   : > { %v2014_v22 = vmul.f32 -1.442695, %v334_v21 }
 0x107   : > { %2360 = vpow2.f32 %v2014_v22  ;;  %v338_v23 = vpop.f32.mrb[2].mxu0 }
 0x108   : > { %v340_v24 = vpop.f32.mrb[3].mxu0 }
 0x109   : > { %v2015_v25 = vmul.f32 -1.442695, %v340_v24 }
 0x10b   : > { %2362 = vpow2.f32 %v2015_v25  ;;  %v344_v26 = vpop.f32.mrb[4].mxu0 }
 0x10c   : > { %v346_v27 = vpop.f32.mrb[5].mxu0 }
 0x10d   : > { %v2016_v28 = vmul.f32 -1.442695, %v346_v27 }
 0x10f   : > { %2364 = vpow2.f32 %v2016_v28  ;;  %v350_v29 = vpop.f32.mrb[6].mxu0 }
 0x110   : > { %v352_v30 = vpop.f32.mrb[7].mxu0 }
 0x111   : > { %v2361_v31 = vpop.eup %2360  ;;  %v2017_v32 = vmul.f32 -1.442695, %v352_v30  ;;  %v1122_v30 = vld [vmem:[%s3973_s4 + $0x118] sm:$0xff] }
 0x112   : > { %v412_v33 = vadd.f32 1.0, %v2361_v31  ;;  %v1119_v31 = vld [vmem:[%s3973_s4 + $0x100] sm:$0xff] }
 0x113   : > { %2366 = vpow2.f32 %v2017_v32  ;;  %v356_v34 = vpop.f32.mrb[8].mxu0 }
 0x114   : > { %2368 = vrcp.f32 %v412_v33  ;;  %v358_v35 = vpop.f32.mrb[9].mxu0  ;;  %v1121_v33 = vld [vmem:[%s3973_s4 + $0x110] sm:$0xff] }
 0x115   : > { %v2363_v36 = vpop.eup %2362  ;;  %v2018_v37 = vmul.f32 -1.442695, %v358_v35  ;;  %v1126_v35 = vld [vmem:[%s3973_s4 + $0x138] sm:$0xff] }
 0x116   : > { %v413_v38 = vadd.f32 1.0, %v2363_v36  ;;  %v2185_v36 = vpack.c.bf16 %v1121_v33, %v1119_v31 }
 0x117   : > { %2370 = vpow2.f32 %v2018_v37  ;;  %v362_v39 = vpop.f32.mrb[10].mxu0 }
 0x118   : > { %2372 = vrcp.f32 %v413_v38  ;;  %v364_v40 = vpop.f32.mrb[11].mxu0  ;;  %v1123_v38 = vld [vmem:[%s3973_s4 + $0x120] sm:$0xff] }
 0x119   : > { %v2365_v41 = vpop.eup %2364  ;;  %v2019_v42 = vmul.f32 -1.442695, %v364_v40  ;;  %v1128_v40 = vld [vmem:[%s3973_s4 + $0x148] sm:$0xff] }
 0x11a   : > { %v414_v43 = vadd.f32 1.0, %v2365_v41  ;;  %v1130_v41 = vld [vmem:[%s3973_s4 + $0x158] sm:$0xff] }
 0x11b   : > { %2374 = vpow2.f32 %v2019_v42  ;;  %v368_v44 = vpop.f32.mrb[12].mxu0 }
 0x11c   : > { %2376 = vrcp.f32 %v414_v43  ;;  %v370_v45 = vpop.f32.mrb[13].mxu0  ;;  %v2191_v43 = vpack.c.bf16 %v1130_v41, %v1128_v40 }
 0x11d   : > { %v2367_v46 = vpop.eup %2366  ;;  %v2020_v47 = vmul.f32 -1.442695, %v370_v45  ;;  %v1129_v45 = vld [vmem:[%s3973_s4 + $0x150] sm:$0xff] }
 0x11e   : > { %v2369_v48 = vpop.eup %2368  ;;  %v415_v49 = vadd.f32 1.0, %v2367_v46  ;;  %v1132_v46 = vld [vmem:[%s3973_s4 + $0x168] sm:$0xff] }
 0x11f   : > { %2378 = vpow2.f32 %v2020_v47  ;;  %v374_v50 = vpop.f32.mrb[14].mxu0  ;;  %v439_v51 = vmul.f32 %v2369_v48, %v332_v20  ;;  %v1134_v47 = vld [vmem:[%s3973_s4 + $0x178] sm:$0xff] }
 0x120   : > { %2380 = vrcp.f32 %v415_v49  ;;  %v376_v52 = vpop.f32.mrb[15].mxu0  ;;  %v2195_v49 = vpack.c.bf16 %v1134_v47, %v1132_v46 }
 0x121   : > { %v2371_v53 = vpop.eup %2370  ;;  %v2021_v54 = vmul.f32 -1.442695, %v376_v52  ;;  %v448_v55 = vmax.f32 %v439_v51, 0.0  ;;  %v1133_v51 = vld [vmem:[%s3973_s4 + $0x170] sm:$0xff]  ;;  %v1136_v52 = vld [vmem:[%s3973_s4 + $0x188] sm:$0xff] }
 0x122   : > { %v2373_v56 = vpop.eup %2372  ;;  %v416_v57 = vadd.f32 1.0, %v2371_v53  ;;  %v1138_v53 = vld [vmem:[%s3973_s4 + $0x198] sm:$0xff] }
 0x123   : > { %2382 = vpow2.f32 %v2021_v54  ;;  %v380_v58 = vpop.f32.mrb[16].mxu0  ;;  %2096 = vmatmul.mubr.f32.vlgmr.msra.gmra.mrb[18].mxu0 %v448_v55  ;;  %v440_v59 = vmul.f32 %v2373_v56, %v338_v23  ;;  %v2199_v55 = vpack.c.bf16 %v1138_v53, %v1136_v52  ;;  %v1135_v56 = vld [vmem:[%s3973_s4 + $0x180] sm:$0xff] }
 0x124   : > { %2384 = vrcp.f32 %v416_v57  ;;  %v382_v60 = vpop.f32.mrb[17].mxu0  ;;  %2098 = vmatprep.mubr.msk.f32.mxu0 %vm2430_vm0, %v3975_v7  ;;  %v1137_v57 = vld [vmem:[%s3973_s4 + $0x190] sm:$0xff] }
 0x125   : > { %v2375_v61 = vpop.eup %2374  ;;  %v2022_v62 = vmul.f32 -1.442695, %v382_v60  ;;  %v449_v63 = vmax.f32 %v440_v59, 0.0 }
 0x126   : > { %v2377_v0 = vpop.eup %2376  ;;  %v417_v1 = vadd.f32 1.0, %v2375_v61 }
 0x127   : > { %2386 = vpow2.f32 %v2022_v62  ;;  %2099 = vmatmul.mubr.f32.gmra.mrb[20].mxu0 %v449_v63  ;;  %v441_v2 = vmul.f32 %v2377_v0, %v344_v26 }
 0x128   : > { %2388 = vrcp.f32 %v417_v1  ;;  %2101 = vmatprep.mubr.msk.f32.mxu0 %vm2430_vm0, %v3975_v7 }
 0x129   : > { %v2379_v3 = vpop.eup %2378  ;;  %v450_v4 = vmax.f32 %v441_v2, 0.0 }
 0x12a   : > { %v2381_v5 = vpop.eup %2380  ;;  %v418_v6 = vadd.f32 1.0, %v2379_v3 }
 0x12b   : > { %2102 = vmatmul.mubr.f32.gmra.mrb[22].mxu0 %v450_v4  ;;  %v442_v8 = vmul.f32 %v2381_v5, %v350_v29  ;;  %v1120_v29 = vld [vmem:[%s3973_s4 + $0x108] sm:$0xff] }
 0x12c   : > { %2390 = vrcp.f32 %v418_v6  ;;  %2104 = vmatprep.mubr.msk.f32.mxu0 %vm2430_vm0, %v3975_v7  ;;  %v2183_v32 = vpack.c.bf16 %v1122_v30, %v1120_v29 }
 0x12d   : > { %v2383_v9 = vpop.eup %2382  ;;  %v451_v10 = vmax.f32 %v442_v8, 0.0 }
 0x12e   : > { %v2385_v11 = vpop.eup %2384  ;;  %v419_v12 = vadd.f32 1.0, %v2383_v9  ;;  %2184 = vmatprep.subr.bf16.mxu1 %v2183_v32 }
 0x12f   : > { %2105 = vmatmul.mubr.f32.gmra.mrb[24].mxu0 %v451_v10  ;;  %v443_v13 = vmul.f32 %v2385_v11, %v356_v34  ;;  %v1124_v34 = vld [vmem:[%s3973_s4 + $0x128] sm:$0xff]  ;;  %2186 = vmatpush1.bf16.msra.mxu1 %v2185_v36 }
 0x130   : > { %2392 = vrcp.f32 %v419_v12  ;;  %2107 = vmatprep.mubr.msk.f32.mxu0 %vm2430_vm0, %v3975_v7  ;;  %v2187_v37 = vpack.c.bf16 %v1126_v35, %v1124_v34 }
 0x131   : > { %v2387_v14 = vpop.eup %2386  ;;  %v452_v15 = vmax.f32 %v443_v13, 0.0 }
 0x132   : > { %v2389_v16 = vpop.eup %2388  ;;  %v420_v17 = vadd.f32 1.0, %v2387_v14  ;;  %2188 = vmatprep.subr.bf16.mxu1 %v2187_v37 }
 0x133   : > { %2108 = vmatmul.mubr.f32.gmra.mrb[26].mxu0 %v452_v15  ;;  %v444_v18 = vmul.f32 %v2389_v16, %v362_v39  ;;  %v1125_v39 = vld [vmem:[%s3973_s4 + $0x130] sm:$0xff] }
 0x134   : > { %2394 = vrcp.f32 %v420_v17  ;;  %2110 = vmatprep.mubr.msk.f32.mxu0 %vm2430_vm0, %v3975_v7  ;;  %v2189_v42 = vpack.c.bf16 %v1125_v39, %v1123_v38 }
 0x135   : > { %v453_v19 = vmax.f32 %v444_v18, 0.0 }
 0x136   : > { %v2391_v20 = vpop.eup %2390  ;;  %2190 = vmatpush1.bf16.msra.mxu1 %v2189_v42 }
 0x137   : > { %2111 = vmatmul.mubr.f32.gmra.mrb[28].mxu0 %v453_v19  ;;  %v445_v21 = vmul.f32 %v2391_v20, %v368_v44  ;;  %v1127_v44 = vld [vmem:[%s3973_s4 + $0x140] sm:$0xff]  ;;  %2192 = vmatprep.subr.bf16.mxu1 %v2191_v43 }
 0x138   : > { %2113 = vmatprep.mubr.msk.f32.mxu0 %vm2430_vm0, %v3975_v7  ;;  %v2193_v48 = vpack.c.bf16 %v1129_v45, %v1127_v44 }
 0x139   : > { %v454_v22 = vmax.f32 %v445_v21, 0.0 }
 0x13a   : > { %v2393_v23 = vpop.eup %2392  ;;  %2194 = vmatpush1.bf16.msra.mxu1 %v2193_v48 }
 0x13b   : > { %2114 = vmatmul.mubr.f32.gmra.mrb[30].mxu0 %v454_v22  ;;  %v446_v24 = vmul.f32 %v2393_v23, %v374_v50  ;;  %v1131_v50 = vld [vmem:[%s3973_s4 + $0x160] sm:$0xff]  ;;  %2196 = vmatprep.subr.bf16.mxu1 %v2195_v49 }
 0x13c   : > { %2116 = vmatprep.mubr.msk.f32.mxu0 %vm2430_vm0, %v3975_v7  ;;  %v2197_v54 = vpack.c.bf16 %v1133_v51, %v1131_v50 }
 0x13d   : > { %v455_v25 = vmax.f32 %v446_v24, 0.0 }
 0x13e   : > { %v2395_v26 = vpop.eup %2394  ;;  %2198 = vmatpush1.bf16.msra.mxu1 %v2197_v54 }
 0x13f   : > { %2117 = vmatmul.mubr.f32.gmra.mrb[32].mxu0 %v455_v25  ;;  %v447_v27 = vmul.f32 %v2395_v26, %v380_v58  ;;  %v2201_v58 = vpack.c.bf16 %v1137_v57, %v1135_v56  ;;  %2200 = vmatprep.subr.bf16.mxu1 %v2199_v55 }
 0x140   : > { %2119 = vmatprep.mubr.msk.f32.mxu0 %vm2430_vm0, %v3975_v7 }
 0x141   : > { %v456_v28 = vmax.f32 %v447_v27, 0.0 }
 0x142   : > { %2202 = vmatpush1.bf16.msra.mxu1 %v2201_v58 }
 0x143   : > { %2120 = vmatmul.mubr.f32.gmra.mrb[34].mxu0 %v456_v28 }
 0x144   : > { %788 = vmatprep.mubr.f32.mxu0 %v3975_v7 }
 0x1f6   : > { %v539_v59 = vpop.f32.mrb[18].mxu0 }
 0x1f7   : > { %v615_v60 = vrot.slane %v539_v59, 2  ;;  %v647_v61 = vrot.slane %v539_v59, 4  ;;  %v679_v62 = vrot.slane %v539_v59, 6  ;;  %v2097_v63 = vpop.f32.mrb[19].mxu0  ;;  %v599_v0 = vrot.slane %v539_v59, 1 }
 0x1f8   : > { %v631_v1 = vrot.slane %v539_v59, 3  ;;  %v663_v2 = vrot.slane %v539_v59, 5  ;;  %v584_v4 = vsel %vm583_vm1, %v539_v59, 0.0  ;;  %v695_v5 = vrot.slane %v539_v59, 7 }
 0x1f9   : > { %v600_v3 = vsel %vm583_vm1, %v599_v0, 0.0  ;;  %v616_v9 = vsel %vm583_vm1, %v615_v60, 0.0  ;;  %v648_v10 = vsel %vm583_vm1, %v647_v61, 0.0  ;;  %v680_v11 = vsel %vm583_vm1, %v679_v62, 0.0 }
 0x1fa   : > { %v544_v6 = vpop.f32.mrb[20].mxu0  ;;  %v632_v8 = vsel %vm583_vm1, %v631_v1, 0.0  ;;  %v664_v19 = vsel %vm583_vm1, %v663_v2, 0.0  ;;  %v696_v41 = vsel %vm583_vm1, %v695_v5, 0.0 }
 0x1fb   : > { %v617_v12 = vrot.slane %v544_v6, 2  ;;  %v649_v13 = vrot.slane %v544_v6, 4  ;;  %v681_v14 = vrot.slane %v544_v6, 6  ;;  %v2100_v15 = vpop.f32.mrb[21].mxu0  ;;  %v601_v16 = vrot.slane %v544_v6, 1 }
 0x1fc   : > { %v586_v17 = vsel %vm585_vm2, %v544_v6, %v584_v4  ;;  %v633_v18 = vrot.slane %v544_v6, 3  ;;  %v665_v20 = vrot.slane %v544_v6, 5  ;;  %v711_v28 = vsel %vm583_vm1, %v544_v6, 0.0 }
 0x1fd   : > { %v602_v21 = vsel %vm585_vm2, %v601_v16, %v600_v3  ;;  %v618_v22 = vsel %vm585_vm2, %v617_v12, %v616_v9  ;;  %v650_v23 = vsel %vm585_vm2, %v649_v13, %v648_v10  ;;  %v682_v24 = vsel %vm585_vm2, %v681_v14, %v680_v11 }
 0x1fe   : > { %v549_v25 = vpop.f32.mrb[22].mxu0  ;;  %v634_v26 = vsel %vm585_vm2, %v633_v18, %v632_v8  ;;  %v666_v27 = vsel %vm585_vm2, %v665_v20, %v664_v19 }
 0x1ff   : > { %v2103_v29 = vpop.f32.mrb[23].mxu0  ;;  %v603_v30 = vrot.slane %v549_v25, 1  ;;  %v588_v31 = vsel %vm587_vm3, %v549_v25, %v586_v17  ;;  %v635_v32 = vrot.slane %v549_v25, 3  ;;  %v619_v33 = vrot.slane %v549_v25, 2 }
 0x200   : > { %v667_v34 = vrot.slane %v549_v25, 5  ;;  %v651_v35 = vrot.slane %v549_v25, 4  ;;  %v697_v36 = vrot.slane %v549_v25, 7  ;;  %v712_v37 = vsel %vm585_vm2, %v549_v25, %v711_v28 }
 0x201   : > { %v604_v38 = vsel %vm587_vm3, %v603_v30, %v602_v21  ;;  %v636_v39 = vsel %vm587_vm3, %v635_v32, %v634_v26  ;;  %v620_v40 = vsel %vm587_vm3, %v619_v33, %v618_v22 }
 0x202   : > { %v554_v42 = vpop.f32.mrb[24].mxu0  ;;  %v668_v43 = vsel %vm587_vm3, %v667_v34, %v666_v27  ;;  %v652_v44 = vsel %vm587_vm3, %v651_v35, %v650_v23  ;;  %v698_v45 = vsel %vm585_vm2, %v697_v36, %v696_v41 }
 0x203   : > { %v2106_v46 = vpop.f32.mrb[25].mxu0  ;;  %v605_v47 = vrot.slane %v554_v42, 1  ;;  %v590_v48 = vsel %vm589_vm4, %v554_v42, %v588_v31  ;;  %v637_v49 = vrot.slane %v554_v42, 3  ;;  %v621_v50 = vrot.slane %v554_v42, 2 }
 0x204   : > { %v653_v51 = vrot.slane %v554_v42, 4  ;;  %v699_v52 = vrot.slane %v554_v42, 7  ;;  %v683_v53 = vrot.slane %v554_v42, 6  ;;  %v713_v54 = vsel %vm587_vm3, %v554_v42, %v712_v37 }
 0x205   : > { %v606_v55 = vsel %vm589_vm4, %v605_v47, %v604_v38  ;;  %v638_v56 = vsel %vm589_vm4, %v637_v49, %v636_v39  ;;  %v622_v57 = vsel %vm589_vm4, %v621_v50, %v620_v40 }
 0x206   : > { %v559_v58 = vpop.f32.mrb[26].mxu0  ;;  %v654_v59 = vsel %vm589_vm4, %v653_v51, %v652_v44  ;;  %v700_v60 = vsel %vm587_vm3, %v699_v52, %v698_v45  ;;  %v684_v61 = vsel %vm587_vm3, %v683_v53, %v682_v24 }
 0x207   : > { %v2109_v62 = vpop.f32.mrb[27].mxu0  ;;  %v607_v63 = vrot.slane %v559_v58, 1  ;;  %v592_v0 = vsel %vm591_vm5, %v559_v58, %v590_v48  ;;  %v639_v1 = vrot.slane %v559_v58, 3  ;;  %v623_v2 = vrot.slane %v559_v58, 2 }
 0x208   : > { %v669_v3 = vrot.slane %v559_v58, 5  ;;  %v701_v4 = vrot.slane %v559_v58, 7  ;;  %v685_v5 = vrot.slane %v559_v58, 6  ;;  %v714_v6 = vsel %vm589_vm4, %v559_v58, %v713_v54 }
 0x209   : > { %v608_v8 = vsel %vm591_vm5, %v607_v63, %v606_v55  ;;  %v640_v9 = vsel %vm591_vm5, %v639_v1, %v638_v56  ;;  %v624_v10 = vsel %vm591_vm5, %v623_v2, %v622_v57 }
 0x20a   : > { %v564_v11 = vpop.f32.mrb[28].mxu0  ;;  %v670_v12 = vsel %vm589_vm4, %v669_v3, %v668_v43  ;;  %v702_v13 = vsel %vm589_vm4, %v701_v4, %v700_v60  ;;  %v686_v14 = vsel %vm589_vm4, %v685_v5, %v684_v61 }
 0x20b   : > { %v2112_v15 = vpop.f32.mrb[29].mxu0  ;;  %v609_v16 = vrot.slane %v564_v11, 1  ;;  %v594_v17 = vsel %vm593_vm6, %v564_v11, %v592_v0  ;;  %v625_v18 = vrot.slane %v564_v11, 2  ;;  %v671_v19 = vrot.slane %v564_v11, 5 }
 0x20c   : > { %v655_v20 = vrot.slane %v564_v11, 4  ;;  %v703_v21 = vrot.slane %v564_v11, 7  ;;  %v687_v22 = vrot.slane %v564_v11, 6  ;;  %v715_v23 = vsel %vm591_vm5, %v564_v11, %v714_v6 }
 0x20d   : > { %v610_v24 = vsel %vm593_vm6, %v609_v16, %v608_v8  ;;  %v626_v25 = vsel %vm593_vm6, %v625_v18, %v624_v10  ;;  %v672_v26 = vsel %vm591_vm5, %v671_v19, %v670_v12  ;;  %v719_v10 = vld [vmem:[%s3970_s1] sm:$0xff]  ;;  %v1142_v18 = vld [vmem:[%s3973_s4 + $0x1b8] sm:$0xff] }
 0x20e   : > { %v569_v27 = vpop.f32.mrb[30].mxu0  ;;  %v656_v28 = vsel %vm591_vm5, %v655_v20, %v654_v59  ;;  %v704_v29 = vsel %vm591_vm5, %v703_v21, %v702_v13  ;;  %v688_v30 = vsel %vm591_vm5, %v687_v22, %v686_v14  ;;  %v1139_v20 = vld [vmem:[%s3973_s4 + $0x1a0] sm:$0xff]  ;;  %v1141_v21 = vld [vmem:[%s3973_s4 + $0x1b0] sm:$0xff] }
 0x20f   : > { %v2115_v31 = vpop.f32.mrb[31].mxu0  ;;  %v611_v32 = vrot.slane %v569_v27, 1  ;;  %v596_v33 = vsel %vm595_vm7, %v569_v27, %v594_v17  ;;  %v641_v34 = vrot.slane %v569_v27, 3  ;;  %v673_v35 = vrot.slane %v569_v27, 5  ;;  %v1140_v17 = vld [vmem:[%s3973_s4 + $0x1a8] sm:$0xff] }
 0x210   : > { %v657_v36 = vrot.slane %v569_v27, 4  ;;  %v705_v37 = vrot.slane %v569_v27, 7  ;;  %v689_v38 = vrot.slane %v569_v27, 6  ;;  %v716_v39 = vsel %vm593_vm6, %v569_v27, %v715_v23  ;;  %v1144_v23 = vld [vmem:[%s3973_s4 + $0x1c8] sm:$0xff]  ;;  %v1145_v27 = vld [vmem:[%s3973_s4 + $0x1d0] sm:$0xff]  ;;  %v1147_v31 = vld [vmem:[%s3973_s4 + $0x1e0] sm:$0xff] }
 0x211   : > { %v612_v40 = vsel %vm595_vm7, %v611_v32, %v610_v24  ;;  %v642_v41 = vsel %vm593_vm6, %v641_v34, %v640_v9  ;;  %v674_v42 = vsel %vm593_vm6, %v673_v35, %v672_v26  ;;  %v2203_v19 = vpack.c.bf16 %v1142_v18, %v1140_v17  ;;  %v1146_v24 = vld [vmem:[%s3973_s4 + $0x1d8] sm:$0xff]  ;;  %v1143_v26 = vld [vmem:[%s3973_s4 + $0x1c0] sm:$0xff]  ;;  %v1088_v34 = vld [vmem:[%s3973_s4 + $0x8] sm:$0xff] }
 0x212   : > { %v574_v43 = vpop.f32.mrb[32].mxu0  ;;  %v658_v44 = vsel %vm593_vm6, %v657_v36, %v656_v28  ;;  %v706_v45 = vsel %vm593_vm6, %v705_v37, %v704_v29  ;;  %v690_v46 = vsel %vm593_vm6, %v689_v38, %v688_v30  ;;  %v2205_v22 = vpack.c.bf16 %v1141_v21, %v1139_v20  ;;  %v1148_v29 = vld [vmem:[%s3973_s4 + $0x1e8] sm:$0xff]  ;;  %v1150_v30 = vld [vmem:[%s3973_s4 + $0x1f8] sm:$0xff]  ;;  %v2843_v38 = vld [vmem:[%s3973_s4] sm:$0xff] }
 0x213   : > { %v2118_v47 = vpop.f32.mrb[33].mxu0  ;;  %v598_v48 = vsel %vm597_vm8, %v574_v43, %v596_v33  ;;  %v643_v49 = vrot.slane %v574_v43, 3  ;;  %v627_v50 = vrot.slane %v574_v43, 2  ;;  %v675_v51 = vrot.slane %v574_v43, 5  ;;  %2204 = vmatprep.subr.bf16.mxu1 %v2203_v19  ;;  %v1149_v33 = vld [vmem:[%s3973_s4 + $0x1f0] sm:$0xff]  ;;  %v1090_v35 = vld [vmem:[%s3973_s4 + $0x18] sm:$0xff] }
 0x214   : > { %v659_v52 = vrot.slane %v574_v43, 4  ;;  %v707_v53 = vrot.slane %v574_v43, 7  ;;  %v691_v54 = vrot.slane %v574_v43, 6  ;;  %v717_v55 = vsel %vm595_vm7, %v574_v43, %v716_v39  ;;  %2206 = vmatpush1.bf16.msra.mxu1 %v2205_v22  ;;  %v2848_v39 = vld [vmem:[%s3973_s4 + $0x10] sm:$0xff]  ;;  %v3043_v18 = vld [vmem:[%s3973_s4 + $0x248] sm:$0xff]  ;;  %v3048_v19 = vld [vmem:[%s3973_s4 + $0x258] sm:$0xff] }
 0x215   : > { %v644_v56 = vsel %vm595_vm7, %v643_v49, %v642_v41  ;;  %v628_v57 = vsel %vm595_vm7, %v627_v50, %v626_v25  ;;  %v676_v58 = vsel %vm595_vm7, %v675_v51, %v674_v42  ;;  %v2207_v25 = vpack.c.bf16 %v1146_v24, %v1144_v23  ;;  %v2858_v41 = vld [vmem:[%s3973_s4 + $0x38] sm:$0xff]  ;;  %v2863_v42 = vld [vmem:[%s3973_s4 + $0x20] sm:$0xff]  ;;  %v2868_v43 = vld [vmem:[%s3973_s4 + $0x30] sm:$0xff]  ;;  %4032 = vst [vmem:[#allocation20_spill] sm:$0xff] %v3043_v18 }
 0x216   : > { %v579_v59 = vpop.f32.mrb[34].mxu0  ;;  %v660_v60 = vsel %vm595_vm7, %v659_v52, %v658_v44  ;;  %v708_v61 = vsel %vm595_vm7, %v707_v53, %v706_v45  ;;  %v692_v62 = vsel %vm595_vm7, %v691_v54, %v690_v46  ;;  %v2209_v28 = vpack.c.bf16 %v1145_v27, %v1143_v26  ;;  %v2873_v44 = vld [vmem:[%s3973_s4 + $0x48] sm:$0xff]  ;;  %v2878_v45 = vld [vmem:[%s3973_s4 + $0x58] sm:$0xff]  ;;  %v2883_v46 = vld [vmem:[%s3973_s4 + $0x40] sm:$0xff]  ;;  %4033 = vst [vmem:[#allocation21_spill] sm:$0xff] %v3048_v19 }
 0x217   : > { %v2121_v63 = vpop.f32.mrb[35].mxu0  ;;  %v613_v0 = vrot.slane %v579_v59, 1  ;;  %v645_v1 = vrot.slane %v579_v59, 3  ;;  %v629_v2 = vrot.slane %v579_v59, 2  ;;  %v677_v3 = vrot.slane %v579_v59, 5  ;;  %2208 = vmatprep.subr.bf16.mxu1 %v2207_v25  ;;  %v2888_v47 = vld [vmem:[%s3973_s4 + $0x50] sm:$0xff] }
 0x218   : > { %v661_v4 = vrot.slane %v579_v59, 4  ;;  %v709_v5 = vrot.slane %v579_v59, 7  ;;  %v693_v6 = vrot.slane %v579_v59, 6  ;;  %v718_v8 = vsel %vm597_vm8, %v579_v59, %v717_v55  ;;  %2210 = vmatpush1.bf16.msra.mxu1 %v2209_v28  ;;  %v2898_v49 = vld [vmem:[%s3973_s4 + $0x78] sm:$0xff]  ;;  %v2903_v50 = vld [vmem:[%s3973_s4 + $0x60] sm:$0xff]  ;;  %v2908_v51 = vld [vmem:[%s3973_s4 + $0x70] sm:$0xff] }
 0x219   : > { %v614_v9 = vsel %vm597_vm8, %v613_v0, %v612_v40  ;;  %v646_v11 = vsel %vm597_vm8, %v645_v1, %v644_v56  ;;  %v630_v12 = vsel %vm597_vm8, %v629_v2, %v628_v57  ;;  %v678_v13 = vsel %vm597_vm8, %v677_v3, %v676_v58  ;;  %v2853_v40 = vld [vmem:[%s3973_s4 + $0x28] sm:$0xff]  ;;  %v2918_v53 = vld [vmem:[%s3973_s4 + $0x98] sm:$0xff]  ;;  %v2923_v54 = vld [vmem:[%s3973_s4 + $0x80] sm:$0xff] }
 0x21a   : > { %724 = vmatprep.subr.mxu0 %v614_v9  ;;  %v662_v14 = vsel %vm597_vm8, %v661_v4, %v660_v60  ;;  %v710_v15 = vsel %vm597_vm8, %v709_v5, %v708_v61  ;;  %v694_v16 = vsel %vm597_vm8, %v693_v6, %v692_v62  ;;  %v2211_v32 = vpack.c.bf16 %v1150_v30, %v1148_v29  ;;  %v2913_v52 = vld [vmem:[%s3973_s4 + $0x88] sm:$0xff]  ;;  %v2928_v55 = vld [vmem:[%s3973_s4 + $0x90] sm:$0xff]  ;;  %v2938_v57 = vld [vmem:[%s3973_s4 + $0xb8] sm:$0xff] }
 0x21b   : > { %725 = vmatpush1.msra.mxu0 %v598_v48  ;;  %v2213_v36 = vpack.c.bf16 %v1149_v33, %v1147_v31  ;;  %v2215_v37 = vpack.c.bf16 %v1090_v35, %v1088_v34  ;;  %v2893_v48 = vld [vmem:[%s3973_s4 + $0x68] sm:$0xff]  ;;  %v2943_v58 = vld [vmem:[%s3973_s4 + $0xa0] sm:$0xff]  ;;  %v2948_v59 = vld [vmem:[%s3973_s4 + $0xb0] sm:$0xff] }
 0x21c   : > { %2023 = vmatmul.mubr.msk.f32.vlgmr.msra.gmra.mrb[36].mxu0 %vm720_vm9, %v719_v10  ;;  %795 = vmatprep.subr.mxu0 %v646_v11  ;;  %v2933_v56 = vld [vmem:[%s3973_s4 + $0xa8] sm:$0xff]  ;;  %4014 = vst [vmem:[#allocation2_spill] sm:$0xff] %v2943_v58  ;;  %4015 = vst [vmem:[#allocation3_spill] sm:$0xff] %v2948_v59  ;;  %v2958_v61 = vld [vmem:[%s3973_s4 + $0xd8] sm:$0xff] }
 0x21d   : > { %796 = vmatpush1.msra.mxu0 %v630_v12  ;;  %859 = vmatprep.mubr.f32.mxu0 %v3975_v7  ;;  %v2953_v60 = vld [vmem:[%s3973_s4 + $0xc8] sm:$0xff]  ;;  %4017 = vst [vmem:[#allocation5_spill] sm:$0xff] %v2958_v61  ;;  %v2963_v62 = vld [vmem:[%s3973_s4 + $0xc0] sm:$0xff]  ;;  %v2968_v63 = vld [vmem:[%s3973_s4 + $0xd0] sm:$0xff] }
 0x21e   : > { %866 = vmatprep.subr.mxu0 %v678_v13  ;;  %2212 = vmatprep.subr.bf16.mxu1 %v2211_v32  ;;  %4016 = vst [vmem:[#allocation4_spill] sm:$0xff] %v2953_v60  ;;  %4018 = vst [vmem:[#allocation6_spill] sm:$0xff] %v2963_v62  ;;  %v2973_v0 = vld [vmem:[%s3973_s4 + $0xe8] sm:$0xff]  ;;  %v2978_v1 = vld [vmem:[%s3973_s4 + $0xf8] sm:$0xff] }
 0x21f   : > { %2214 = vmatpush1.bf16.msra.mxu1 %v2213_v36  ;;  %4019 = vst [vmem:[#allocation7_spill] sm:$0xff] %v2968_v63  ;;  %4020 = vst [vmem:[#allocation8_spill] sm:$0xff] %v2973_v0  ;;  %v2983_v2 = vld [vmem:[%s3973_s4 + $0xe0] sm:$0xff]  ;;  %v2988_v3 = vld [vmem:[%s3973_s4 + $0xf0] sm:$0xff] }
 0x220   : > { %2024 = vmatmul.mubr.msk.f32.vlgmr.msra.gmra.mrb[38].mxu0 %vm720_vm9, %v719_v10  ;;  %2216 = vmatprep.subr.bf16.mxu1 %v2215_v37  ;;  %4021 = vst [vmem:[#allocation9_spill] sm:$0xff] %v2978_v1  ;;  %4022 = vst [vmem:[#allocation10_spill] sm:$0xff] %v2983_v2  ;;  %v2993_v4 = vld [vmem:[%s3973_s4 + $0x208] sm:$0xff]  ;;  %v2998_v5 = vld [vmem:[%s3973_s4 + $0x218] sm:$0xff] }
 0x221   : > { %867 = vmatpush1.msra.mxu0 %v662_v14  ;;  %930 = vmatprep.mubr.f32.mxu0 %v3975_v7  ;;  %4023 = vst [vmem:[#allocation11_spill] sm:$0xff] %v2988_v3  ;;  %4024 = vst [vmem:[#allocation12_spill] sm:$0xff] %v2993_v4  ;;  %v3003_v6 = vld [vmem:[%s3973_s4 + $0x200] sm:$0xff]  ;;  %v3020_v11 = vld [vmem:[%s3973_s4 + $0x238] sm:$0xff] }
 0x222   : > { %937 = vmatprep.subr.mxu0 %v710_v15  ;;  %4025 = vst [vmem:[#allocation13_spill] sm:$0xff] %v2998_v5  ;;  %4026 = vst [vmem:[#allocation14_spill] sm:$0xff] %v3003_v6  ;;  %v3025_v12 = vld [vmem:[%s3973_s4 + $0x220] sm:$0xff]  ;;  %v3038_v17 = vld [vmem:[%s3973_s4 + $0x230] sm:$0xff] }
 0x223   : > { %4029 = vst [vmem:[#allocation17_spill] sm:$0xff] %v3020_v11  ;;  %4030 = vst [vmem:[#allocation18_spill] sm:$0xff] %v3025_v12  ;;  %v3061_v24 = vld [vmem:[%s3973_s4 + $0x240] sm:$0xff]  ;;  %v3066_v25 = vld [vmem:[%s3973_s4 + $0x250] sm:$0xff] }
 0x224   : > { %2025 = vmatmul.mubr.msk.f32.vlgmr.msra.gmra.mrb[40].mxu0 %vm720_vm9, %v719_v10  ;;  %4031 = vst [vmem:[#allocation19_spill] sm:$0xff] %v3038_v17  ;;  %4034 = vst [vmem:[#allocation22_spill] sm:$0xff] %v3061_v24  ;;  %v3071_v26 = vld [vmem:[%s3973_s4 + $0x268] sm:$0xff]  ;;  %v3084_v31 = vld [vmem:[%s3973_s4 + $0x278] sm:$0xff] }
 0x225   : > { %938 = vmatpush1.msra.mxu0 %v694_v16  ;;  %1001 = vmatprep.mubr.f32.mxu0 %v3975_v7  ;;  %4035 = vst [vmem:[#allocation23_spill] sm:$0xff] %v3066_v25  ;;  %4036 = vst [vmem:[#allocation24_spill] sm:$0xff] %v3071_v26  ;;  %v3089_v32 = vld [vmem:[%s3973_s4 + $0x260] sm:$0xff]  ;;  %v3094_v33 = vld [vmem:[%s3973_s4 + $0x270] sm:$0xff] }
 0x226   : > { %2122 = vmatprep.subr.mxu0 %v3975_v7  ;;  %4037 = vst [vmem:[#allocation25_spill] sm:$0xff] %v3084_v31  ;;  %4038 = vst [vmem:[#allocation26_spill] sm:$0xff] %v3089_v32  ;;  %v3107_v29 = vld [vmem:[%s3973_s4 + $0x288] sm:$0xff]  ;;  %v3112_v28 = vld [vmem:[%s3973_s4 + $0x298] sm:$0xff] }
 0x227   : > { %4039 = vst [vmem:[#allocation27_spill] sm:$0xff] %v3094_v33  ;;  %4040 = vst [vmem:[#allocation28_spill] sm:$0xff] %v3107_v29 }
 0x228   : > { %2026 = vmatmul.mubr.msk.f32.vlgmr.msra.gmra.mrb[42].mxu0 %vm720_vm9, %v719_v10  ;;  %4041 = vst [vmem:[#allocation29_spill] sm:$0xff] %v3112_v28 }
 0x229   : > { %2123 = vmatpush3.msra.mxu0 %v718_v8  ;;  %2124 = vmatprep.mubr.msk.f32.mxu0 %vm2430_vm0, %v3975_v7  ;;  %v3008_v8 = vld [vmem:[%s3973_s4 + $0x210] sm:$0xff] }
 0x22a   : > { %4027 = vst [vmem:[#allocation15_spill] sm:$0xff] %v3008_v8 }
 0x22c   : > { %2125 = vmatmul.mubr.msk.f32.vlgmr.msra.gmra.mrb[44].mxu0 %vm720_vm9, %v719_v10  ;;  %v3015_v10 = vld [vmem:[%s3973_s4 + $0x228] sm:$0xff] }
 0x22d   : > { %4028 = vst [vmem:[#allocation16_spill] sm:$0xff] %v3015_v10 }
 0x2ef   : > { %v790_v34 = vpop.f32.mrb[36].mxu0 }
 0x2f0   : > { %v3114_v35 = vmax.f32 %v790_v34, 0.0  ;;  %v792_v27 = vpop.f32.mrb[37].mxu0 }
 0x2f1   : > { %v3122_v23 = vmax.f32 %v792_v27, 0.0 }
 0x2f2   : > { %v1260_v20 = vrot.slane %v3114_v35, 4  ;;  %v1215_v36 = vsel %vm583_vm1, %v3114_v35, 0.0 }
 0x2f3   : > { %v861_v30 = vpop.f32.mrb[38].mxu0  ;;  %v3978_v16 = vrot.slane %v3122_v23, 3  ;;  %v1305_v22 = vsel %vm583_vm1, %v3122_v23, 0.0  ;;  %v4045_v6 = vrot.slane %v3122_v23, 7  ;;  %v4050_v59 = vrot.slane %v3122_v23, 6 }
 0x2f4   : > { %v3141_v15 = vmax.f32 %v861_v30, 0.0  ;;  %v863_v14 = vpop.f32.mrb[39].mxu0  ;;  %v1261_v13 = vsel %vm583_vm1, %v1260_v20, 0.0 }
 0x2f5   : > { %v3146_v27 = vmax.f32 %v863_v14, 0.0  ;;  %v1263_v9 = vsel %vm585_vm2, %v3978_v16, %v1261_v13  ;;  %v1217_v8 = vsel %vm585_vm2, %v4045_v6, %v1215_v36 }
 0x2f6   : > { %v3154_v30 = vrot.slane %v3141_v15, 7  ;;  %v3157_v34 = vrot.slane %v3141_v15, 2  ;;  %v3160_v20 = vrot.slane %v3141_v15, 5  ;;  %v1562_v29 = vsel %vm583_vm1, %v3141_v15, 0.0 }
 0x2f7   : > { %v932_v37 = vpop.f32.mrb[40].mxu0  ;;  %v3164_v7 = vrot.slane %v3146_v27, 6  ;;  %v3167_v13 = vrot.slane %v3146_v27, 1  ;;  %v3170_v21 = vrot.slane %v3146_v27, 7  ;;  %v3183_v33 = vrot.slane %v3146_v27, 4 }
 0x2f8   : > { %4042 = vst [vmem:[#allocation30_spill] sm:$0xff] %v3157_v34  ;;  %4043 = vst [vmem:[#allocation31_spill] sm:$0xff] %v3160_v20  ;;  %v3174_v16 = vmax.f32 %v932_v37, 0.0  ;;  %v934_v28 = vpop.f32.mrb[41].mxu0  ;;  %v3178_v32 = vsel %vm587_vm3, %v3157_v34, %v1263_v9  ;;  %v1306_v14 = vsel %vm585_vm2, %v3154_v30, %v1305_v22  ;;  %v3198_v22 = vsel %vm583_vm1, %v3160_v20, 0.0 }
 0x2f9   : > { %v3185_v26 = vmax.f32 %v934_v28, 0.0  ;;  %v1307_v31 = vsel %vm587_vm3, %v3164_v7, %v1306_v14  ;;  %v1314_v37 = vsel %vm583_vm1, %v3167_v13, 0.0  ;;  %v1563_v24 = vsel %vm585_vm2, %v3170_v21, %v1562_v29 }
 0x2fa   : > { %v3194_v9 = vrot.slane %v3174_v16, 5  ;;  %v1315_v28 = vsel %vm585_vm2, %v3174_v16, %v1314_v37  ;;  %v3203_v25 = vrot.slane %v3174_v16, 6  ;;  %v3229_v5 = vrot.slane %v3174_v16, 3 }
 0x2fb   : > { %v1003_v14 = vpop.f32.mrb[42].mxu0  ;;  %v3206_v18 = vrot.slane %v3185_v26, 4  ;;  %v3209_v19 = vrot.slane %v3185_v26, 7  ;;  %v3212_v29 = vrot.slane %v3185_v26, 2  ;;  %v3215_v12 = vrot.slane %v3185_v26, 5 }
 0x2fc   : > { %v3217_v17 = vmax.f32 %v1003_v14, 0.0  ;;  %v1308_v37 = vsel %vm589_vm4, %v3194_v9, %v1307_v31  ;;  %v1564_v10 = vsel %vm587_vm3, %v3203_v25, %v1563_v24  ;;  %v1005_v11 = vpop.f32.mrb[43].mxu0  ;;  %v3255_v0 = vrot.slane %v3146_v27, 5 }
 0x2fd   : > { %4044 = vst [vmem:[#allocation32_spill] sm:$0xff] %v3212_v29  ;;  %v1309_v4 = vsel %vm591_vm5, %v3206_v18, %v1308_v37  ;;  %v1316_v14 = vsel %vm587_vm3, %v3209_v19, %v1315_v28  ;;  %v1565_v31 = vsel %vm589_vm4, %v3215_v12, %v1564_v10  ;;  %v1323_v37 = vsel %vm583_vm1, %v3212_v29, 0.0 }
 0x2fe   : > { %v3236_v2 = vrot.slane %v3217_v17, 3  ;;  %v3239_v24 = vrot.slane %v3217_v17, 6  ;;  %v3242_v6 = vrot.slane %v3217_v17, 1  ;;  %v1331_v36 = vrot.slane %v3217_v17, 4 }
 0x2ff   : > { %v1767_v28 = vsel %vm583_vm1, %v3215_v12, 0.0  ;;  %v3249_v3 = vpop.f32.mrb[44].mxu0  ;;  %v3252_v10 = vrot.slane %v3141_v15, 6 }
 0x300   : > { %4046 = vst [vmem:[#allocation33_spill] sm:$0xff] %v3236_v2  ;;  %4047 = vst [vmem:[#allocation34_spill] sm:$0xff] %v3242_v6  ;;  %v1311_v1 = vsel %vm593_vm6, %v3236_v2, %v1309_v4  ;;  %v1318_v62 = vsel %vm589_vm4, %v3239_v24, %v1316_v14  ;;  %v1325_v63 = vsel %vm585_vm2, %v3242_v6, %v1323_v37  ;;  %v2126_v61 = vpop.f32.mrb[45].mxu0  ;;  %v4051_v4 = vrot.slane %v3122_v23, 1 }
 0x301   : > { %4048 = vst [vmem:[#allocation35_spill] sm:$0xff] %v3249_v3  ;;  %v3264_v60 = vsel %vm591_vm5, %v1331_v36, %v1565_v31  ;;  %v4049_v3 = vrot.slane %v3122_v23, 3  ;;  %v1319_v29 = vsel %vm591_vm5, %v4050_v59, %v1318_v62  ;;  %v3276_v14 = vsel %vm585_vm2, %v1331_v36, %v1767_v28 }
 0x302   : > { %v1326_v2 = vsel %vm587_vm3, %v4051_v4, %v1325_v63  ;;  %4052 = vst [vmem:[#allocation36_spill] sm:$0xff] %v3276_v14  ;;  %v1320_v61 = vsel %vm593_vm6, %v3160_v20, %v1319_v29  ;;  %v1219_v63 = vsel %vm587_vm3, %v3252_v10, %v1217_v8  ;;  %v4053_v29 = vpack.c.bf16 %v2848_v39, %v2843_v38 }
 0x303   : > { %v1312_v58 = vsel %vm595_vm7, %v4049_v3, %v1311_v1  ;;  %v1327_v1 = vsel %vm589_vm4, %v3141_v15, %v1326_v2  ;;  %v3284_v3 = vmax.f32 %v1005_v11, 0.0  ;;  %v1321_v59 = vsel %vm595_vm7, %v3183_v33, %v1320_v61 }
 0x304   : > { %v1313_v31 = vsel %vm597_vm8, %v3157_v34, %v1312_v58  ;;  %v1328_v62 = vsel %vm591_vm5, %v3170_v21, %v1327_v1  ;;  %v3293_v58 = vrot.slane %v3141_v15, 3  ;;  %v4054_v2 = vmov 0.0  }
 0x305   : > { %1425 = vmatmul.mubr.f32.vlgmr.msra.gmra.mrb[0].mxu1 %v1313_v31  ;;  %v1322_v11 = vsel %vm597_vm8, %v3229_v5, %v1321_v59  ;;  %v1329_v37 = vsel %vm593_vm6, %v3203_v25, %v1328_v62  ;;  %v1221_v28 = vsel %vm589_vm4, %v3255_v0, %v1219_v63  ;;  %v3306_v8 = vrot.slane %v3146_v27, 2 }
 0x306   : > { %2218 = vmatpush1.bf16.msra.mxu1 %v4053_v29  ;;  %1430 = vmatprep.mubr.f32.mxu1 %v4054_v2  ;;  %v4055_v4 = vpack.c.bf16 %v2858_v41, %v2853_v40  ;;  %v1330_v38 = vsel %vm595_vm7, %v3215_v12, %v1329_v37  ;;  %v3314_v39 = vrot.slane %v3174_v16, 1  ;;  %v4056_v31 = vrot.slane %v3122_v23, 4 }
 0x307   : > { %v3320_v1 = vrot.slane %v3217_v17, 7  ;;  %v1332_v59 = vsel %vm597_vm8, %v1331_v36, %v1330_v38  ;;  %v3326_v40 = vrot.slane %v3174_v16, 4  ;;  %v3329_v41 = vrot.slane %v3185_v26, 3 }
 0x308   : > { %2220 = vmatprep.subr.bf16.mxu1 %v4055_v4  ;;  %v1333_v61 = vsel %vm583_vm1, %v4056_v31, 0.0  ;;  %v3334_v29 = vrot.slane %v3141_v15, 1  ;;  %v3337_v37 = vrot.slane %v3174_v16, 7  ;;  %v1342_v36 = vsel %vm583_vm1, %v3255_v0, 0.0 }
 0x309   : > { %v1334_v62 = vsel %vm585_vm2, %v3293_v58, %v1333_v61  ;;  %1431 = vmatmul.mubr.f32.gmra.mrb[2].mxu1 %v1322_v11  ;;  %v4057_v4 = vpack.c.bf16 %v2868_v43, %v2863_v42  ;;  %v1343_v38 = vsel %vm585_vm2, %v3326_v40, %v1342_v36  ;;  %v3350_v31 = vrot.slane %v3217_v17, 2 }
 0x30a   : > { %v1335_v63 = vsel %vm587_vm3, %v3306_v8, %v1334_v62  ;;  %1436 = vmatprep.mubr.f32.mxu1 %v4054_v2  ;;  %v3353_v61 = vrot.slane %v3185_v26, 6  ;;  %v4058_v62 = vpack.c.bf16 %v2878_v45, %v2873_v44  ;;  %v1231_v43 = vsel %vm583_vm1, %v3334_v29, 0.0 }
 0x30b   : > { %2222 = vmatpush1.bf16.msra.mxu1 %v4057_v4  ;;  %v1336_v11 = vsel %vm589_vm4, %v3314_v39, %v1335_v63  ;;  %v1344_v63 = vsel %vm587_vm3, %v3329_v41, %v1343_v38  ;;  %v3365_v36 = vrot.slane %v3141_v15, 4  ;;  %v3372_v44 = vrot.slane %v3146_v27, 3 }
 0x30c   : > { %2224 = vmatprep.subr.bf16.mxu1 %v4058_v62  ;;  %v1337_v42 = vsel %vm591_vm5, %v3185_v26, %v1336_v11  ;;  %v1346_v14 = vsel %vm589_vm4, %v3350_v31, %v1344_v63  ;;  %v3375_v45 = vrot.slane %v3174_v16, 2  ;;  %v4059_v11 = vrot.slane %v3122_v23, 7 }
 0x30d   : > { %v1339_v4 = vsel %vm593_vm6, %v3320_v1, %v1337_v42  ;;  %1437 = vmatmul.mubr.f32.gmra.mrb[4].mxu1 %v1332_v59  ;;  %v4060_v62 = vrot.slane %v3122_v23, 2  ;;  %v3384_v42 = vrot.slane %v3185_v26, 1  ;;  %v1351_v63 = vsel %vm583_vm1, %v3353_v61, 0.0 }
 0x30e   : > { %v1340_v38 = vsel %vm595_vm7, %v4059_v11, %v1339_v4  ;;  %v4061_v20 = vpack.c.bf16 %v2888_v47, %v2883_v46  ;;  %1442 = vmatprep.mubr.f32.mxu1 %v4054_v2  ;;  %v1223_v11 = vsel %vm591_vm5, %v3326_v40, %v1221_v28 }
 0x30f   : > { %v1347_v6 = vsel %vm591_vm5, %v4060_v62, %v1346_v14  ;;  %v1341_v59 = vsel %vm597_vm8, %v3252_v10, %v1340_v38  ;;  %v3397_v14 = vrot.slane %v3217_v17, 5  ;;  %v4062_v62 = vpack.c.bf16 %v2898_v49, %v2893_v48 }
 0x310   : > { %2226 = vmatpush1.bf16.msra.mxu1 %v4061_v20  ;;  %v1348_v4 = vsel %vm593_vm6, %v3334_v29, %v1347_v6  ;;  %v1225_v47 = vsel %vm593_vm6, %v3329_v41, %v1223_v11  ;;  %v1232_v20 = vsel %vm585_vm2, %v3146_v27, %v1231_v43  ;;  %v1246_v6 = vsel %vm583_vm1, %v3375_v45, 0.0 }
 0x311   : > { %2228 = vmatprep.subr.bf16.mxu1 %v4062_v62  ;;  %v1349_v46 = vsel %vm595_vm7, %v3146_v27, %v1348_v4  ;;  %v1353_v28 = vsel %vm585_vm2, %v3397_v14, %v1351_v63  ;;  %v4063_v48 = vrot.slane %v3114_v35, 3  ;;  %v1234_v4 = vsel %vm587_vm3, %v3337_v37, %v1232_v20  ;;  %1443 = vmatmul.mubr.f32.gmra.mrb[6].mxu1 %v1341_v59 }
 0x312   : > { %v1350_v38 = vsel %vm597_vm8, %v3337_v37, %v1349_v46  ;;  %v4064_v11 = vrot.slane %v3122_v23, 5  ;;  %v4065_v62 = vrot.slane %v3122_v23, 2  ;;  %v1236_v63 = vsel %vm589_vm4, %v3353_v61, %v1234_v4  ;;  %1448 = vmatprep.mubr.f32.mxu1 %v4054_v2 }
 0x313   : > { %v1227_v49 = vsel %vm595_vm7, %v4063_v48, %v1225_v47  ;;  %v1248_v46 = vsel %vm585_vm2, %v3384_v42, %v1246_v6  ;;  %v4066_v47 = vpack.c.bf16 %v2908_v51, %v2903_v50  ;;  %v4067_v20 = vrot.slane %v3114_v35, 6 }
 0x314   : > { %v1354_v43 = vsel %vm587_vm3, %v4064_v11, %v1353_v28  ;;  %v3427_v34 = vsel %vm597_vm8, %v4065_v62, %v1227_v49  ;;  %v1249_v48 = vrot.slane %v3114_v35, 1  ;;  %v1267_v49 = vsel %vm589_vm4, %v3167_v13, %v3178_v32 }
 0x315   : > { %2230 = vmatpush1.bf16.msra.mxu1 %v4066_v47  ;;  %v1355_v59 = vsel %vm589_vm4, %v3365_v36, %v1354_v43  ;;  %v1238_v28 = vsel %vm591_vm5, %v4067_v20, %v1236_v63  ;;  %v4068_v6 = vpack.c.bf16 %v2918_v53, %v2913_v52  ;;  %v4069_v51 = vmov %v4064_v11 }
 0x316   : > { %v1356_v50 = vsel %vm591_vm5, %v3372_v44, %v1355_v59  ;;  %v1240_v4 = vsel %vm593_vm6, %v4069_v51, %v1238_v28  ;;  %v1268_v11 = vsel %vm591_vm5, %v3174_v16, %v1267_v49  ;;  %v1271_v43 = vrot.slane %v3114_v35, 7  ;;  %1449 = vmatmul.mubr.f32.gmra.mrb[8].mxu1 %v1350_v38 }
 0x317   : > { %2232 = vmatprep.subr.bf16.mxu1 %v4068_v6  ;;  %v1357_v62 = vsel %vm593_vm6, %v3375_v45, %v1356_v50  ;;  %v1242_v32 = vsel %vm595_vm7, %v3365_v36, %v1240_v4  ;;  %v1250_v52 = vsel %vm587_vm3, %v1249_v48, %v1248_v46  ;;  %v1270_v53 = vsel %vm593_vm6, %v3209_v19, %v1268_v11 }
 0x318   : > { %v1358_v63 = vsel %vm595_vm7, %v3384_v42, %v1357_v62  ;;  %v3468_v47 = vsel %vm597_vm8, %v3372_v44, %v1242_v32  ;;  %v1251_v59 = vsel %vm589_vm4, %v3122_v23, %v1250_v52  ;;  %v1272_v20 = vsel %vm595_vm7, %v1271_v43, %v1270_v53  ;;  %1454 = vmatprep.mubr.f32.mxu1 %v4054_v2  ;;  %v4073_v62 = vld [vmem:[#allocation32_spill] sm:$0xff]  ;;  %v4074_v53 = vld [vmem:[#allocation3_spill] sm:$0xff] }
 0x319   : > { %v4070_v28 = vpack.c.bf16 %v2928_v55, %v2923_v54  ;;  %v1359_v38 = vsel %vm597_vm8, %v3217_v17, %v1358_v63  ;;  %v1253_v46 = vsel %vm591_vm5, %v3154_v30, %v1251_v59  ;;  %v4071_v48 = vrot.slane %v3122_v23, 6  ;;  %v4075_v63 = vld [vmem:[#allocation2_spill] sm:$0xff] }
 0x31a   : > { %v1283_v6 = vrot.slane %v3114_v35, 2  ;;  %v4072_v50 = vpack.c.bf16 %v2938_v57, %v2933_v56  ;;  %v1255_v54 = vsel %vm593_vm6, %v3164_v7, %v1253_v46  ;;  %v1278_v55 = vsel %vm585_vm2, %v3183_v33, %v3198_v22  ;;  %1455 = vmatmul.mubr.f32.gmra.mrb[10].mxu1 %v1359_v38 }
 0x31b   : > { %2234 = vmatpush1.bf16.msra.mxu1 %v4070_v28  ;;  %v3484_v49 = vsel %vm597_vm8, %v4071_v48, %v1272_v20  ;;  %v1291_v51 = vsel %vm583_vm1, %v3203_v25, 0.0  ;;  %v1294_v4 = vrot.slane %v3114_v35, 5  ;;  %v1257_v11 = vsel %vm595_vm7, %v3194_v9, %v1255_v54  ;;  %1525 = vmatprep.mubr.f32.mxu1 %v4054_v2  ;;  %v4078_v48 = vld [vmem:[#allocation5_spill] sm:$0xff] }
 0x31c   : > { %2236 = vmatprep.subr.bf16.mxu1 %v4072_v50  ;;  %v1280_v43 = vsel %vm587_vm3, %v3229_v5, %v1278_v55  ;;  %v1293_v56 = vsel %vm585_vm2, %v3215_v12, %v1291_v51  ;;  %v1567_v57 = vrot.slane %v3284_v3, 3  ;;  %v3507_v22 = vsel %vm597_vm8, %v3206_v18, %v1257_v11  ;;  %v4079_v50 = vld [vmem:[#allocation4_spill] sm:$0xff] }
 0x31d   : > { %v1282_v32 = vsel %vm589_vm4, %v4073_v62, %v1280_v43  ;;  %v1295_v35 = vsel %vm587_vm3, %v1294_v4, %v1293_v56  ;;  %v1571_v52 = vsel %vm583_vm1, %v3314_v39, 0.0  ;;  %v4076_v59 = vpack.c.bf16 %v4074_v53, %v4075_v63  ;;  %v4083_v53 = vld [vmem:[#allocation7_spill] sm:$0xff]  ;;  %v4084_v63 = vld [vmem:[#allocation6_spill] sm:$0xff] }
 0x31e   : > { %v1284_v12 = vsel %vm591_vm5, %v1283_v6, %v1282_v32  ;;  %v4077_v20 = vrot.slane %v3122_v23, 4  ;;  %v1568_v38 = vsel %vm593_vm6, %v1567_v57, %v3264_v60  ;;  %v1574_v46 = vrot.slane %v3284_v3, 6  ;;  %v4082_v32 = vld [vmem:[#allocation35_spill] sm:$0xff] }
 0x31f   : > { %2238 = vmatpush1.bf16.msra.mxu1 %v4076_v59  ;;  %v4080_v54 = vpack.c.bf16 %v4078_v48, %v4079_v50  ;;  %v4081_v55 = vrot.slane %v3122_v23, 1  ;;  %v1569_v4 = vsel %vm595_vm7, %v3293_v58, %v1568_v38  ;;  %v1572_v11 = vsel %vm585_vm2, %v3185_v26, %v1571_v52  ;;  %v4086_v48 = vld [vmem:[#allocation9_spill] sm:$0xff]  ;;  %v4087_v50 = vld [vmem:[#allocation8_spill] sm:$0xff] }
 0x320   : > { %v1297_v28 = vsel %vm589_vm4, %v4077_v20, %v1295_v35  ;;  %v3545_v23 = vsel %vm597_vm8, %v3306_v8, %v1569_v4  ;;  %v1573_v56 = vsel %vm587_vm3, %v3320_v1, %v1572_v11  ;;  %v3550_v35 = vmax.f32 %v4082_v32, 0.0 }
 0x321   : > { %2240 = vmatprep.subr.bf16.mxu1 %v4080_v54  ;;  %v1286_v51 = vsel %vm593_vm6, %v4081_v55, %v1284_v12  ;;  %v1299_v6 = vsel %vm591_vm5, %v3293_v58, %v1297_v28  ;;  %v1575_v52 = vsel %vm589_vm4, %v1574_v46, %v1573_v56  ;;  %v4085_v59 = vpack.c.bf16 %v4083_v53, %v4084_v63  ;;  %v4090_v53 = vld [vmem:[#allocation10_spill] sm:$0xff] }
 0x322   : > { %v1287_v60 = vsel %vm595_vm7, %v3141_v15, %v1286_v51  ;;  %v1301_v43 = vsel %vm593_vm6, %v3306_v8, %v1299_v6  ;;  %v1576_v20 = vsel %vm591_vm5, %v3252_v10, %v1575_v52  ;;  %v1580_v28 = vsel %vm583_vm1, %v3350_v31, 0.0  ;;  %v4089_v52 = vld [vmem:[#allocation11_spill] sm:$0xff] }
 0x323   : > { %v3554_v58 = vsel %vm597_vm8, %v3170_v21, %v1287_v60  ;;  %v1303_v15 = vsel %vm595_vm7, %v3314_v39, %v1301_v43  ;;  %2242 = vmatpush1.bf16.msra.mxu1 %v4085_v59  ;;  %v1581_v38 = vrot.slane %v3284_v3, 1  ;;  %v4088_v54 = vpack.c.bf16 %v4086_v48, %v4087_v50  ;;  %v4092_v48 = vld [vmem:[#allocation13_spill] sm:$0xff]  ;;  %v4093_v50 = vld [vmem:[#allocation12_spill] sm:$0xff] }
 0x324   : > { %v3566_v12 = vsel %vm597_vm8, %v3185_v26, %v1303_v15  ;;  %v1577_v55 = vsel %vm593_vm6, %v3255_v0, %v1576_v20  ;;  %v1588_v51 = vrot.slane %v3284_v3, 4  ;;  %v1730_v6 = vsel %vm583_vm1, %v3146_v27, 0.0 }
 0x325   : > { %2244 = vmatprep.subr.bf16.mxu1 %v4088_v54  ;;  %v1590_v10 = vsel %vm583_vm1, %v3365_v36, 0.0  ;;  %v1578_v4 = vsel %vm595_vm7, %v3326_v40, %v1577_v55  ;;  %v1582_v11 = vsel %vm585_vm2, %v1581_v38, %v1580_v28  ;;  %v1731_v60 = vsel %vm585_vm2, %v3337_v37, %v1730_v6 }
 0x326   : > { %v1591_v43 = vsel %vm585_vm2, %v3372_v44, %v1590_v10  ;;  %v3594_v56 = vsel %vm597_vm8, %v3329_v41, %v1578_v4  ;;  %v1583_v36 = vsel %vm587_vm3, %v3334_v29, %v1582_v11  ;;  %v1732_v32 = vsel %vm587_vm3, %v3353_v61, %v1731_v60 }
 0x327   : > { %v1592_v15 = vsel %vm587_vm3, %v3375_v45, %v1591_v43  ;;  %v4091_v63 = vpack.c.bf16 %v4089_v52, %v4090_v53  ;;  %v1584_v59 = vsel %vm589_vm4, %v3146_v27, %v1583_v36  ;;  %v1733_v20 = vsel %vm589_vm4, %v3397_v14, %v1732_v32  ;;  %v4095_v32 = vld [vmem:[#allocation33_spill] sm:$0xff]  ;;  %v4096_v52 = vld [vmem:[#allocation15_spill] sm:$0xff]  ;;  %v4097_v53 = vld [vmem:[#allocation14_spill] sm:$0xff] }
 0x328   : > { %v1593_v28 = vsel %vm589_vm4, %v3384_v42, %v1592_v15  ;;  %v1595_v29 = vrot.slane %v3284_v3, 7  ;;  %v4094_v54 = vpack.c.bf16 %v4092_v48, %v4093_v50  ;;  %v1585_v55 = vsel %vm591_vm5, %v3337_v37, %v1584_v59  ;;  %v4102_v50 = vld [vmem:[#allocation30_spill] sm:$0xff] }
 0x329   : > { %2246 = vmatpush1.bf16.msra.mxu1 %v4091_v63  ;;  %v1734_v6 = vsel %vm591_vm5, %v1588_v51, %v1733_v20  ;;  %v1594_v27 = vsel %vm591_vm5, %v3217_v17, %v1593_v28  ;;  %v1599_v10 = vsel %vm583_vm1, %v3194_v9, 0.0  ;;  %v1586_v4 = vsel %vm593_vm6, %v3353_v61, %v1585_v55  ;;  %v4099_v20 = vld [vmem:[#allocation17_spill] sm:$0xff]  ;;  %v4100_v28 = vld [vmem:[#allocation16_spill] sm:$0xff] }
 0x32a   : > { %2248 = vmatprep.subr.bf16.mxu1 %v4094_v54  ;;  %v1596_v11 = vsel %vm593_vm6, %v1595_v29, %v1594_v27  ;;  %v1600_v60 = vsel %vm585_vm2, %v3206_v18, %v1599_v10  ;;  %v1602_v43 = vrot.slane %v3284_v3, 2  ;;  %v1587_v37 = vsel %vm595_vm7, %v3397_v14, %v1586_v4 }
 0x32b   : > { %v1597_v36 = vsel %vm595_vm7, %v3154_v30, %v1596_v11  ;;  %v1601_v15 = vsel %vm587_vm3, %v4095_v32, %v1600_v60  ;;  %v1608_v61 = vsel %vm583_vm1, %v3239_v24, 0.0  ;;  %v4098_v63 = vpack.c.bf16 %v4096_v52, %v4097_v53  ;;  %v4104_v52 = vld [vmem:[#allocation18_spill] sm:$0xff] }
 0x32c   : > { %1526 = vmatmul.mubr.f32.vlgmr.msra.gmra.mrb[0].mxu1 %v3427_v34  ;;  %v3642_v34 = vsel %vm597_vm8, %v1588_v51, %v1587_v37  ;;  %v3646_v14 = vsel %vm597_vm8, %v3164_v7, %v1597_v36  ;;  %v1603_v30 = vsel %vm589_vm4, %v1602_v43, %v1601_v15  ;;  %v1748_v59 = vsel %vm583_vm1, %v1602_v43, 0.0  ;;  %v4103_v15 = vld [vmem:[#allocation19_spill] sm:$0xff] }
 0x32d   : > { %2250 = vmatpush1.bf16.msra.mxu1 %v4098_v63  ;;  %1531 = vmatprep.mubr.f32.mxu1 %v4054_v2  ;;  %v4101_v48 = vpack.c.bf16 %v4099_v20, %v4100_v28  ;;  %v1604_v54 = vsel %vm591_vm5, %v4102_v50, %v1603_v30  ;;  %v1609_v55 = vrot.slane %v3284_v3, 5  ;;  %v1735_v51 = vrot.slane %v3550_v35, 3  ;;  %v4107_v30 = vld [vmem:[#allocation21_spill] sm:$0xff] }
 0x32e   : > { %v1739_v27 = vsel %vm583_vm1, %v3384_v42, 0.0  ;;  %v1605_v10 = vsel %vm593_vm6, %v3167_v13, %v1604_v54  ;;  %v1742_v11 = vrot.slane %v3550_v35, 6  ;;  %v1749_v60 = vrot.slane %v3550_v35, 1 }
 0x32f   : > { %2252 = vmatprep.subr.bf16.mxu1 %v4101_v48  ;;  %v1740_v4 = vsel %vm585_vm2, %v3217_v17, %v1739_v27  ;;  %v1606_v43 = vsel %vm595_vm7, %v3174_v16, %v1605_v10  ;;  %v1610_v37 = vsel %vm585_vm2, %v1609_v55, %v1608_v61  ;;  %v1736_v36 = vsel %vm593_vm6, %v1735_v51, %v1734_v6 }
 0x330   : > { %1532 = vmatmul.mubr.f32.gmra.mrb[2].mxu1 %v3468_v47  ;;  %v1741_v42 = vsel %vm587_vm3, %v1595_v29, %v1740_v4  ;;  %v4105_v53 = vpack.c.bf16 %v4103_v15, %v4104_v52  ;;  %v3677_v17 = vsel %vm597_vm8, %v3209_v19, %v1606_v43  ;;  %v4106_v47 = vld [vmem:[#allocation31_spill] sm:$0xff]  ;;  %v1737_v61 = vsel %vm595_vm7, %v3372_v44, %v1736_v36  ;;  %v4108_v29 = vld [vmem:[#allocation20_spill] sm:$0xff] }
 0x331   : > { %1537 = vmatprep.mubr.f32.mxu1 %v4054_v2  ;;  %v1611_v63 = vsel %vm587_vm3, %v4106_v47, %v1610_v37  ;;  %v1756_v6 = vrot.slane %v3550_v35, 4  ;;  %v4109_v20 = vpack.c.bf16 %v4107_v30, %v4108_v29  ;;  %v3691_v48 = vsel %vm597_vm8, %v3375_v45, %v1737_v61  ;;  %v4114_v37 = vld [vmem:[#allocation25_spill] sm:$0xff]  ;;  %v4115_v36 = vld [vmem:[#allocation24_spill] sm:$0xff]  ;;  %v1172_v47 = vld [vmem:[%s3973_s4 + $0x2a8] sm:$0xff] }
 0x332   : > { %2254 = vmatpush1.bf16.msra.mxu1 %v4105_v53  ;;  %v1612_v28 = vsel %vm589_vm4, %v3183_v33, %v1611_v63  ;;  %v1743_v50 = vsel %vm589_vm4, %v1742_v11, %v1741_v42  ;;  %v1750_v54 = vsel %vm585_vm2, %v1749_v60, %v1748_v59  ;;  %v1758_v10 = vsel %vm583_vm1, %v3183_v33, 0.0  ;;  %v4110_v11 = vld [vmem:[#allocation23_spill] sm:$0xff]  ;;  %v4111_v60 = vld [vmem:[#allocation22_spill] sm:$0xff]  ;;  %v1169_v15 = vld [vmem:[%s3973_s4 + $0x290] sm:$0xff] }
 0x333   : > { %2256 = vmatprep.subr.bf16.mxu1 %v4109_v20  ;;  %v1613_v44 = vsel %vm591_vm5, %v3229_v5, %v1612_v28  ;;  %v1744_v51 = vsel %vm591_vm5, %v3164_v7, %v1743_v50  ;;  %v1751_v27 = vsel %vm587_vm3, %v3167_v13, %v1750_v54  ;;  %v1759_v7 = vsel %vm585_vm2, %v3229_v5, %v1758_v10  ;;  %v4113_v33 = vld [vmem:[#allocation34_spill] sm:$0xff]  ;;  %v1174_v63 = vld [vmem:[%s3973_s4 + $0x2b8] sm:$0xff]  ;;  %v4117_v30 = vld [vmem:[#allocation36_spill] sm:$0xff] }
 0x334   : > { %1538 = vmatmul.mubr.f32.gmra.mrb[4].mxu1 %v3507_v22  ;;  %v1614_v45 = vsel %vm593_vm6, %v4073_v62, %v1613_v44  ;;  %v1745_v59 = vsel %vm593_vm6, %v3194_v9, %v1744_v51  ;;  %v1752_v4 = vsel %vm589_vm4, %v3174_v16, %v1751_v27  ;;  %v4112_v13 = vpack.c.bf16 %v4110_v11, %v4111_v60  ;;  %v1167_v42 = vld [vmem:[%s3973_s4 + $0x280] sm:$0xff]  ;;  %v4118_v28 = vld [vmem:[#allocation27_spill] sm:$0xff]  ;;  %v4121_v51 = vld [vmem:[#allocation29_spill] sm:$0xff] }
 0x335   : > { %1543 = vmatprep.mubr.f32.mxu1 %v4054_v2  ;;  %v1615_v22 = vsel %vm595_vm7, %v4113_v33, %v1614_v45  ;;  %v1746_v43 = vsel %vm595_vm7, %v3206_v18, %v1745_v59  ;;  %v1753_v9 = vsel %vm591_vm5, %v3209_v19, %v1752_v4  ;;  %v1763_v16 = vrot.slane %v3550_v35, 7  ;;  %v4119_v50 = vld [vmem:[#allocation26_spill] sm:$0xff]  ;;  %v4122_v27 = vld [vmem:[#allocation28_spill] sm:$0xff]  ;;  %v1176_v60 = vld [vmem:[%s3973_s4 + $0x2c8] sm:$0xff] }
 0x336   : > { %2258 = vmatpush1.bf16.msra.mxu1 %v4112_v13  ;;  %v4116_v5 = vpack.c.bf16 %v4114_v37, %v4115_v36  ;;  %v3734_v18 = vsel %vm597_vm8, %v3284_v3, %v1615_v22  ;;  %v3738_v19 = vsel %vm597_vm8, %v4095_v32, %v1746_v43  ;;  %v1754_v52 = vsel %vm593_vm6, %v3239_v24, %v1753_v9  ;;  %v1171_v59 = vld [vmem:[%s3973_s4 + $0x2a0] sm:$0xff]  ;;  %v1173_v4 = vld [vmem:[%s3973_s4 + $0x2b0] sm:$0xff]  ;;  %v1178_v13 = vld [vmem:[%s3973_s4 + $0x2d8] sm:$0xff] }
 0x337   : > { %v1760_v53 = vsel %vm587_vm3, %v4073_v62, %v1759_v7  ;;  %v1755_v61 = vsel %vm595_vm7, %v1609_v55, %v1754_v52  ;;  %v1769_v24 = vsel %vm587_vm3, %v1567_v57, %v4117_v30  ;;  %v1770_v62 = vrot.slane %v3550_v35, 2  ;;  %v1185_v52 = vld [vmem:[%s3973_s4 + $0x310] sm:$0xff] }
 0x338   : > { %2260 = vmatprep.subr.bf16.mxu1 %v4116_v5  ;;  %v1761_v32 = vsel %vm589_vm4, %v4113_v33, %v1760_v53  ;;  %1544 = vmatmul.mubr.f32.gmra.mrb[6].mxu1 %v3484_v49  ;;  %v3760_v29 = vsel %vm597_vm8, %v1756_v6, %v1755_v61  ;;  %v1777_v55 = vrot.slane %v3550_v35, 5  ;;  %v4120_v54 = vpack.c.bf16 %v4118_v28, %v4119_v50  ;;  %v1179_v5 = vld [vmem:[%s3973_s4 + $0x2e0] sm:$0xff]  ;;  %v1188_v53 = vld [vmem:[%s3973_s4 + $0x328] sm:$0xff]  ;;  %v1189_v30 = vld [vmem:[%s3973_s4 + $0x330] sm:$0xff] }
 0x339   : > { %v1762_v20 = vsel %vm591_vm5, %v3284_v3, %v1761_v32  ;;  %1549 = vmatprep.mubr.f32.mxu1 %v4054_v2  ;;  %v2265_v44 = vpack.c.bf16 %v1169_v15, %v1167_v42  ;;  %v1776_v57 = vsel %vm583_vm1, %v1574_v46, 0.0  ;;  %v1771_v6 = vsel %vm589_vm4, %v1770_v62, %v1769_v24  ;;  %v1181_v3 = vld [vmem:[%s3973_s4 + $0x2f0] sm:$0xff]  ;;  %v1183_v15 = vld [vmem:[%s3973_s4 + $0x300] sm:$0xff]  ;;  %v1192_v24 = vld [vmem:[%s3973_s4 + $0x348] sm:$0xff] }
 0x33a   : > { %2262 = vmatpush1.bf16.msra.mxu1 %v4120_v54  ;;  %v1764_v49 = vsel %vm593_vm6, %v1763_v16, %v1762_v20  ;;  %v4123_v10 = vpack.c.bf16 %v4121_v51, %v4122_v27  ;;  %v2267_v45 = vpack.c.bf16 %v1174_v63, %v1172_v47  ;;  %v1772_v7 = vsel %vm591_vm5, %v3306_v8, %v1771_v6  ;;  %v1190_v47 = vld [vmem:[%s3973_s4 + $0x338] sm:$0xff]  ;;  %v1187_v32 = vld [vmem:[%s3973_s4 + $0x320] sm:$0xff]  ;;  %v1193_v50 = vld [vmem:[%s3973_s4 + $0x350] sm:$0xff] }
 0x33b   : > { %v1765_v46 = vsel %vm595_vm7, %v3170_v21, %v1764_v49  ;;  %v1778_v11 = vsel %vm585_vm2, %v1777_v55, %v1776_v57  ;;  %v1773_v21 = vsel %vm593_vm6, %v3314_v39, %v1772_v7  ;;  %v2269_v9 = vpack.c.bf16 %v1173_v4, %v1171_v59  ;;  %v1194_v62 = vld [vmem:[%s3973_s4 + $0x358] sm:$0xff]  ;;  %v1191_v28 = vld [vmem:[%s3973_s4 + $0x340] sm:$0xff]  ;;  %v1196_v54 = vld [vmem:[%s3973_s4 + $0x368] sm:$0xff] }
 0x33c   : > { %2264 = vmatprep.subr.bf16.mxu1 %v4123_v10  ;;  %v3796_v33 = vsel %vm597_vm8, %v3203_v25, %v1765_v46  ;;  %v1779_v8 = vsel %vm587_vm3, %v3255_v0, %v1778_v11  ;;  %1550 = vmatmul.mubr.f32.gmra.mrb[8].mxu1 %v3554_v58  ;;  %v1774_v22 = vsel %vm595_vm7, %v3185_v26, %v1773_v21  ;;  %v1175_v26 = vld [vmem:[%s3973_s4 + $0x2c0] sm:$0xff]  ;;  %v1197_v6 = vld [vmem:[%s3973_s4 + $0x370] sm:$0xff]  ;;  %v1200_v51 = vld [vmem:[%s3973_s4 + $0x388] sm:$0xff] }
 0x33d   : > { %v1780_v43 = vsel %vm589_vm4, %v3326_v40, %v1779_v8  ;;  %1555 = vmatprep.mubr.f32.mxu1 %v4054_v2  ;;  %v3810_v25 = vsel %vm597_vm8, %v3320_v1, %v1774_v22  ;;  %v2271_v0 = vpack.c.bf16 %v1178_v13, %v1176_v60  ;;  %v1177_v40 = vld [vmem:[%s3973_s4 + $0x2d0] sm:$0xff]  ;;  %v1180_v1 = vld [vmem:[%s3973_s4 + $0x2e8] sm:$0xff]  ;;  %v2281_v63 = vpack.c.bf16 %v1185_v52, %v1183_v15  ;;  %v1195_v49 = vld [vmem:[%s3973_s4 + $0x360] sm:$0xff] }
 0x33e   : > { %2266 = vmatpush1.bf16.msra.mxu1 %v2265_v44  ;;  %v1781_v39 = vsel %vm591_vm5, %v3329_v41, %v1780_v43  ;;  %v1182_v41 = vld [vmem:[%s3973_s4 + $0x2f8] sm:$0xff]  ;;  %v2283_v61 = vpack.c.bf16 %v1190_v47, %v1188_v53  ;;  %v2285_v20 = vpack.c.bf16 %v1189_v30, %v1187_v32  ;;  %v2287_v55 = vpack.c.bf16 %v1194_v62, %v1192_v24  ;;  %v1201_v59 = vld [vmem:[%s3973_s4 + $0x390] sm:$0xff]  ;;  %v1204_v4 = vld [vmem:[%s3973_s4 + $0x3a8] sm:$0xff] }
 0x33f   : > { %2268 = vmatprep.subr.bf16.mxu1 %v2267_v45  ;;  %v1782_v58 = vsel %vm593_vm6, %v3350_v31, %v1781_v39  ;;  %v2273_v31 = vpack.c.bf16 %v1177_v40, %v1175_v26  ;;  %v2275_v36 = vpack.c.bf16 %v1182_v41, %v1180_v1  ;;  %v2289_v44 = vpack.c.bf16 %v1193_v50, %v1191_v28  ;;  %v1199_v45 = vld [vmem:[%s3973_s4 + $0x380] sm:$0xff]  ;;  %v1205_v60 = vld [vmem:[%s3973_s4 + $0x3b0] sm:$0xff]  ;;  %v1208_v13 = vld [vmem:[%s3973_s4 + $0x3c8] sm:$0xff] }
 0x340   : > { %v1783_v16 = vsel %vm595_vm7, %v1581_v38, %v1782_v58  ;;  %1556 = vmatmul.mubr.f32.gmra.mrb[10].mxu1 %v3566_v12  ;;  %v1184_v12 = vld [vmem:[%s3973_s4 + $0x308] sm:$0xff]  ;;  %v2277_v38 = vpack.c.bf16 %v1181_v3, %v1179_v5  ;;  %v2293_v27 = vpack.c.bf16 %v1197_v6, %v1195_v49  ;;  %v2297_v46 = vpack.c.bf16 %v1201_v59, %v1199_v45  ;;  %v1203_v11 = vld [vmem:[%s3973_s4 + $0x3a0] sm:$0xff]  ;;  %v1209_v43 = vld [vmem:[%s3973_s4 + $0x3d0] sm:$0xff] }
 0x341   : > { %v3834_v37 = vsel %vm597_vm8, %v3550_v35, %v1783_v16  ;;  %1681 = vmatprep.mubr.f32.mxu1 %v4054_v2  ;;  %v1186_v35 = vld [vmem:[%s3973_s4 + $0x318] sm:$0xff]  ;;  %v2301_v21 = vpack.c.bf16 %v1205_v60, %v1203_v11  ;;  %v1207_v22 = vld [vmem:[%s3973_s4 + $0x3c0] sm:$0xff]  ;;  %v1213_v40 = vld [vmem:[%s3973_s4 + $0x3f0] sm:$0xff] }
 0x342   : > { %2270 = vmatpush1.bf16.msra.mxu1 %v2269_v9  ;;  %v2279_v42 = vpack.c.bf16 %v1186_v35, %v1184_v12  ;;  %v1212_v9 = vld [vmem:[%s3973_s4 + $0x3e8] sm:$0xff]  ;;  %v2305_v39 = vpack.c.bf16 %v1209_v43, %v1207_v22  ;;  %v1211_v26 = vld [vmem:[%s3973_s4 + $0x3e0] sm:$0xff] }
 0x343   : > { %2272 = vmatprep.subr.bf16.mxu1 %v2271_v0  ;;  %v2309_v58 = vpack.c.bf16 %v1213_v40, %v1211_v26 }
 0x346   : > { %2274 = vmatpush1.bf16.msra.mxu1 %v2273_v31 }
 0x347   : > { %2276 = vmatprep.subr.bf16.mxu1 %v2275_v36 }
 0x34a   : > { %2278 = vmatpush1.bf16.msra.mxu1 %v2277_v38 }
 0x34b   : > { %2280 = vmatprep.subr.bf16.mxu1 %v2279_v42 }
 0x34d   : > { %1682 = vmatmul.mubr.f32.vlgmr.msra.gmra.mrb[0].mxu1 %v3545_v23  ;;  %v1198_v23 = vld [vmem:[%s3973_s4 + $0x378] sm:$0xff] }
 0x34e   : > { %2282 = vmatpush1.bf16.msra.mxu1 %v2281_v63  ;;  %1687 = vmatprep.mubr.f32.mxu1 %v4054_v2  ;;  %v2291_v57 = vpack.c.bf16 %v1198_v23, %v1196_v54 }
 0x34f   : > { %2284 = vmatprep.subr.bf16.mxu1 %v2283_v61 }
 0x351   : > { %1688 = vmatmul.mubr.f32.gmra.mrb[2].mxu1 %v3594_v56  ;;  %v1202_v56 = vld [vmem:[%s3973_s4 + $0x398] sm:$0xff] }
 0x352   : > { %2286 = vmatpush1.bf16.msra.mxu1 %v2285_v20  ;;  %1693 = vmatprep.mubr.f32.mxu1 %v4054_v2  ;;  %v2295_v10 = vpack.c.bf16 %v1202_v56, %v1200_v51 }
 0x353   : > { %2288 = vmatprep.subr.bf16.mxu1 %v2287_v55 }
 0x355   : > { %1694 = vmatmul.mubr.f32.gmra.mrb[4].mxu1 %v3642_v34  ;;  %v1206_v34 = vld [vmem:[%s3973_s4 + $0x3b8] sm:$0xff] }
 0x356   : > { %2290 = vmatpush1.bf16.msra.mxu1 %v2289_v44  ;;  %1699 = vmatprep.mubr.f32.mxu1 %v4054_v2  ;;  %v2299_v7 = vpack.c.bf16 %v1206_v34, %v1204_v4 }
 0x357   : > { %2292 = vmatprep.subr.bf16.mxu1 %v2291_v57 }
 0x359   : > { %1700 = vmatmul.mubr.f32.gmra.mrb[6].mxu1 %v3646_v14  ;;  %v1210_v14 = vld [vmem:[%s3973_s4 + $0x3d8] sm:$0xff] }
 0x35a   : > { %2294 = vmatpush1.bf16.msra.mxu1 %v2293_v27  ;;  %1705 = vmatprep.mubr.f32.mxu1 %v4054_v2  ;;  %v2303_v8 = vpack.c.bf16 %v1210_v14, %v1208_v13 }
 0x35b   : > { %2296 = vmatprep.subr.bf16.mxu1 %v2295_v10 }
 0x35d   : > { %1706 = vmatmul.mubr.f32.gmra.mrb[8].mxu1 %v3677_v17  ;;  %v1214_v17 = vld [vmem:[%s3973_s4 + $0x3f8] sm:$0xff] }
 0x35e   : > { %2298 = vmatpush1.bf16.msra.mxu1 %v2297_v46  ;;  %1711 = vmatprep.mubr.f32.mxu1 %v4054_v2  ;;  %v2307_v0 = vpack.c.bf16 %v1214_v17, %v1212_v9 }
 0x35f   : > { %2300 = vmatprep.subr.bf16.mxu1 %v2299_v7 }
 0x361   : > { %1712 = vmatmul.mubr.f32.gmra.mrb[10].mxu1 %v3734_v18 }
 0x362   : > { %2302 = vmatpush1.bf16.msra.mxu1 %v2301_v21  ;;  %1849 = vmatprep.mubr.f32.mxu1 %v4054_v2 }
 0x363   : > { %2304 = vmatprep.subr.bf16.mxu1 %v2303_v8 }
 0x366   : > { %2306 = vmatpush1.bf16.msra.mxu1 %v2305_v39 }
 0x367   : > { %2308 = vmatprep.subr.bf16.mxu1 %v2307_v0 }
 0x36a   : > { %2310 = vmatpush1.bf16.msra.mxu1 %v2309_v58 }
 0x36d   : > { %1850 = vmatmul.mubr.f32.vlgmr.msra.gmra.mrb[0].mxu1 %v3691_v48 }
 0x36e   : > { %1855 = vmatprep.mubr.f32.mxu1 %v4054_v2 }
 0x371   : > { %1856 = vmatmul.mubr.f32.gmra.mrb[2].mxu1 %v3738_v19 }
 0x372   : > { %1861 = vmatprep.mubr.f32.mxu1 %v4054_v2 }
 0x375   : > { %1862 = vmatmul.mubr.f32.gmra.mrb[4].mxu1 %v3760_v29 }
 0x376   : > { %1867 = vmatprep.mubr.f32.mxu1 %v4054_v2 }
 0x379   : > { %1868 = vmatmul.mubr.f32.gmra.mrb[6].mxu1 %v3796_v33 }
 0x37a   : > { %1873 = vmatprep.mubr.f32.mxu1 %v4054_v2 }
 0x37d   : > { %1874 = vmatmul.mubr.f32.gmra.mrb[8].mxu1 %v3810_v25 }
 0x37e   : > { %1879 = vmatprep.mubr.f32.mxu1 %v4054_v2 }
 0x381   : > { %1880 = vmatmul.mubr.f32.gmra.mrb[10].mxu1 %v3834_v37 }
 0x440   : > { %v1851_v48 = vpop.f32.mrb[0].mxu1 }
 0x441   : > { %v1853_v18 = vpop.f32.mrb[1].mxu1 }
 0x442   : > { %v2028_v1 = vmul.f32 -1.442695, %v1853_v18 }
 0x444   : > { %2396 = vpow2.f32 %v2028_v1  ;;  %v1857_v19 = vpop.f32.mrb[2].mxu1 }
 0x445   : > { %v1859_v41 = vpop.f32.mrb[3].mxu1 }
 0x446   : > { %v2029_v16 = vmul.f32 -1.442695, %v1859_v41 }
 0x448   : > { %2398 = vpow2.f32 %v2029_v16  ;;  %v1863_v29 = vpop.f32.mrb[4].mxu1 }
 0x449   : > { %v1865_v31 = vpop.f32.mrb[5].mxu1 }
 0x44a   : > { %v2030_v36 = vmul.f32 -1.442695, %v1865_v31 }
 0x44c   : > { %2400 = vpow2.f32 %v2030_v36  ;;  %v1869_v33 = vpop.f32.mrb[6].mxu1 }
 0x44d   : > { %v1871_v5 = vpop.f32.mrb[7].mxu1 }
 0x44e   : > { %v2397_v3 = vpop.eup %2396  ;;  %v2031_v25 = vmul.f32 -1.442695, %v1871_v5 }
 0x44f   : > { %v1916_v12 = vadd.f32 1.0, %v2397_v3 }
 0x450   : > { %2402 = vpow2.f32 %v2031_v25  ;;  %v1875_v2 = vpop.f32.mrb[8].mxu1 }
 0x451   : > { %2404 = vrcp.f32 %v1916_v12  ;;  %v1877_v37 = vpop.f32.mrb[9].mxu1 }
 0x452   : > { %v2399_v35 = vpop.eup %2398  ;;  %v2032_v38 = vmul.f32 -1.442695, %v1877_v37 }
 0x453   : > { %v1917_v42 = vadd.f32 1.0, %v2399_v35 }
 0x454   : > { %2406 = vpow2.f32 %v2032_v38  ;;  %v1881_v15 = vpop.f32.mrb[10].mxu1 }
 0x455   : > { %2408 = vrcp.f32 %v1917_v42  ;;  %v1883_v52 = vpop.f32.mrb[11].mxu1 }
 0x456   : > { %v2401_v53 = vpop.eup %2400  ;;  %v2033_v47 = vmul.f32 -1.442695, %v1883_v52 }
 0x457   : > { %v1918_v63 = vadd.f32 1.0, %v2401_v53 }
 0x458   : > { %2410 = vpow2.f32 %v2033_v47 }
 0x459   : > { %2412 = vrcp.f32 %v1918_v63 }
 0x45a   : > { %v2403_v61 = vpop.eup %2402 }
 0x45b   : > { %v2405_v32 = vpop.eup %2404  ;;  %v1919_v30 = vadd.f32 1.0, %v2403_v61 }
 0x45c   : > { %v1934_v24 = vmul.f32 %v2405_v32, %v1851_v48 }
 0x45d   : > { %2414 = vrcp.f32 %v1919_v30 }
 0x45e   : > { %v2407_v62 = vpop.eup %2406  ;;  %v1940_v20 = vmax.f32 %v1934_v24, 0.0 }
 0x45f   : > { %v2409_v55 = vpop.eup %2408  ;;  %v1920_v28 = vadd.f32 1.0, %v2407_v62 }
 0x460   : > { %1946 = vst [vmem:[%s224_s11] sm:$0xff] %v1940_v20  ;;  %v1935_v50 = vmul.f32 %v2409_v55, %v1857_v19 }
 0x461   : > { %2416 = vrcp.f32 %v1920_v28 }
 0x462   : > { %v2411_v54 = vpop.eup %2410  ;;  %v1941_v23 = vmax.f32 %v1935_v50, 0.0 }
 0x463   : > { %v2413_v44 = vpop.eup %2412  ;;  %v1921_v57 = vadd.f32 1.0, %v2411_v54 }
 0x464   : > { %1947 = vst [vmem:[%s224_s11 + $0x8] sm:$0xff] %v1941_v23  ;;  %v1936_v49 = vmul.f32 %v2413_v44, %v1863_v29 }
 0x465   : > { %2418 = vrcp.f32 %v1921_v57 }
 0x466   : > { %v1942_v6 = vmax.f32 %v1936_v49, 0.0 }
 0x467   : > { %v2415_v51 = vpop.eup %2414 }
 0x468   : > { %1948 = vst [vmem:[%s224_s11 + $0x10] sm:$0xff] %v1942_v6  ;;  %v1937_v56 = vmul.f32 %v2415_v51, %v1869_v33 }
 0x46a   : > { %v1943_v27 = vmax.f32 %v1937_v56, 0.0 }
 0x46b   : > { %v2417_v10 = vpop.eup %2416 }
 0x46c   : > { %1949 = vst [vmem:[%s224_s11 + $0x18] sm:$0xff] %v1943_v27  ;;  %v1938_v45 = vmul.f32 %v2417_v10, %v1875_v2 }
 0x46e   : > { %v1944_v59 = vmax.f32 %v1938_v45, 0.0 }
 0x46f   : > { %v2419_v4 = vpop.eup %2418 }
 0x470   : > { %1950 = vst [vmem:[%s224_s11 + $0x20] sm:$0xff] %v1944_v59  ;;  %v1939_v34 = vmul.f32 %v2419_v4, %v1881_v15 }
 0x472   : > { %v1945_v46 = vmax.f32 %v1939_v34, 0.0 }
 0x474   : > { %1951 = vst [vmem:[%s224_s11 + $0x28] sm:$0xff] %v1945_v46 }
 0x475 PF: > { %s15_s18 = sadd.s32 1, %s2426_s18  }
 0x476   : > { %p12_p4 = scmp.ge.s32.totalorder %s15_s18, 4  }
 0x478   :  { %14 = sbr.rel (!%p12_p4) target bundleno = 1 (0x1), region = 70 }

</bundles_post_ra>
